<compile_context>
chip_gen: v7x
topology: tpu7x:2x2x1
jax: 0.10.0
libtpu: 0.0.40
codegen_flags: <defaults>
</compile_context>

<pallas_src>
import functools
import math

import jax
import jax.numpy as jnp
from jax.experimental import pallas as pl
from jax.experimental.pallas import tpu as pltpu


# ---------------------------------------------------------------------------
# Fused residual-block kernel (one grid step = `tile` folded batch*H rows)
# ---------------------------------------------------------------------------
def _resblock_kernel(x_ref, w1_ref, s1_ref, b1_ref, w2_ref, s2_ref, b2_ref,
                     o_ref, im_ref, *, C, K, Wout, downsample):
    """conv1(+identity) -> bn1 -> lrelu -> conv2 -> bn2 -> lrelu -> +identity.

    x_ref : (tile, Wout, 2C) even/odd-interleaved rows      (downsample)
            (tile, W,    C ) channels-last rows             (no downsample)
            NOT pre-padded: conv padding is realized by zero-filled boundary
            strips of the im2col scratch.
    w1_ref: (K*C, 2C)  conv1 columns [:C] || fused identity columns [C:]
    w2_ref: (K*C, C)
    s*/b* : (1, C) folded inference-mode BatchNorm scale / bias
    o_ref : (tile, Wout, C)
    im_ref: (tile, Wout, K*C) single im2col scratch, reused by both convs
    """
    P = (K - 1) // 2
    R = x_ref.shape[0]
    M = R * Wout
    cd = im_ref.dtype

    def build_tap(k, col, off, csel):
        """im2col column-block k <- rows of `col` shifted by `off` (zero-padded)."""
        lo = max(0, -off)
        hi = Wout - max(0, off)
        dst = slice(k * C, (k + 1) * C)
        lo_c, hi_c = min(lo, Wout), max(hi, 0)
        if lo_c > 0:                                   # left padding strip
            im_ref[:, :lo_c, dst] = jnp.zeros((R, lo_c, C), cd)
        if hi_c < Wout:                                # right padding strip
            im_ref[:, hi_c:, dst] = jnp.zeros((R, Wout - hi_c, C), cd)
        if hi > lo:                                    # valid data
            im_ref[:, lo:hi, dst] = col[:, lo + off:hi + off, csel].astype(cd)

    # ---- conv1 (+ fused identity path) as ONE im2col matmul ----------------
    for k in range(K):
        if downsample:
            d = k - P                  # stride-2 tap k reads input index 2*o + d
            build_tap(k, x_ref, d // 2, slice((d % 2) * C, (d % 2 + 1) * C))
        else:
            build_tap(k, x_ref, k - P, slice(0, C))
    y1 = jnp.dot(im_ref[...].reshape(M, K * C), w1_ref[...],
                 preferred_element_type=jnp.float32)

    h = y1[:, :C] * s1_ref[...] + b1_ref[...]          # folded BN1 (f32)
    h = jnp.maximum(h, 0.01 * h)                       # F.leaky_relu (slope 0.01)
    ident = y1[:, C:]                                  # identity path (fused in w1)
    h3 = h.reshape(R, Wout, C)

    # ---- conv2 + bn2 + leaky_relu; im2col scratch reused, no hp buffer ------
    for k in range(K):
        build_tap(k, h3, k - P, slice(0, C))
    y2 = jnp.dot(im_ref[...].reshape(M, K * C), w2_ref[...],
                 preferred_element_type=jnp.float32)
    y2 = y2 * s2_ref[...] + b2_ref[...]                # folded BN2 (f32)
    y2 = jnp.maximum(y2, 0.01 * y2)

    # residual add AFTER the second activation, exactly as in the PyTorch module
    o_ref[...] = (y2 + ident).reshape(R, Wout, C).astype(o_ref.dtype)


# ---------------------------------------------------------------------------
# Parameter preparation (done once, outside the hot path)
# ---------------------------------------------------------------------------
def prepare_params(raw, *, downsample, compute_dtype=jnp.bfloat16):
    """Fold BN into scale/bias, pack conv weights into im2col layout, and fuse
    the identity path into conv1's N dimension.

    raw (PyTorch layouts):
      w1, w2 : (Cout, Cin, 1, K) conv weights (bias=False)
      bn1,bn2: (gamma, beta, running_mean, running_var), each (C,)
      wid    : (Cout, Cin, 1, 1) idfunc_1 weight (used only when downsample)
    compute_dtype: bfloat16 recommended (f32 accumulate kept); use float32 for
      a bit-exact residual/identity path.
    """
    C, _, _, K = raw["w1"].shape
    P = (K - 1) // 2

    def im2col_w(w):                     # (Cout, Cin, 1, K) -> (K*Cin, Cout)
        return jnp.transpose(w[:, :, 0, :], (2, 1, 0)).reshape(K * C, C)

    def fold_bn(gamma, beta, mean, var, eps=1e-5):
        s = gamma / jnp.sqrt(var + eps)
        return (s.reshape(1, C).astype(jnp.float32),
                (beta - mean * s).reshape(1, C).astype(jnp.float32))

    w1 = im2col_w(raw["w1"])
    idcols = jnp.zeros((K * C, C), jnp.float32)
    if downsample:
        # AvgPool2d((1,2)) + Conv1x1 == 2-tap stride-2 conv; its taps land on
        # im2col rows [P*C, (P+2)*C) -> fuse with conv1 along N.
        wid = raw["wid"][:, :, 0, 0].T                          # (Cin, Cout)
        idcols = idcols.at[P * C:(P + 1) * C].set(0.5 * wid)
        idcols = idcols.at[(P + 1) * C:(P + 2) * C].set(0.5 * wid)
    else:
        # plain identity == one-hot copy columns at the centre tap
        # (the MXU N columns were idle anyway).
        idcols = idcols.at[P * C:(P + 1) * C].set(jnp.eye(C, dtype=jnp.float32))
    w1 = jnp.concatenate([w1, idcols], axis=1)                  # (K*C, 2C)

    s1, b1 = fold_bn(*raw["bn1"])
    s2, b2 = fold_bn(*raw["bn2"])
    return {"w1": w1.astype(compute_dtype), "s1": s1, "b1": b1,
            "w2": im2col_w(raw["w2"]).astype(compute_dtype), "s2": s2, "b2": b2}


# ---------------------------------------------------------------------------
# Channels-last core (no HBM layout ops) -- the entry point for stacked blocks
# ---------------------------------------------------------------------------
def residual_block_cl(x_rows, prep, *, downsample, im2col_budget_bytes=4 << 20):
    """x_rows: (B*H, W, C) channels-last rows -> (B*H, Wout, C)."""
    BH, W, C = x_rows.shape
    K = prep["w2"].shape[0] // C
    P = (K - 1) // 2
    if W <= 2 * P:
        raise ValueError(f"W={W} too small for kernel size K={K}")

    if downsample:
        if W % 2:
            raise ValueError("downsample requires even W (the PyTorch residual "
                             "add requires it too)")
        Wout = W // 2
        xin = x_rows.reshape(BH, Wout, 2 * C)   # even/odd interleave: metadata only
    else:
        Wout = W
        xin = x_rows

    # Row-tile so the im2col scratch (the dominant VMEM term, ~K x the activation
    # tile) stays within budget; with double-buffered in/out tiles on top this is
    # comfortably inside v5e's 16 MiB scoped default and v7x's 64 MiB physical.
    row_bytes = Wout * K * C * jnp.dtype(prep["w1"].dtype).itemsize
    tile = max(1, min(BH, im2col_budget_bytes // max(row_bytes, 1)))
    while BH % tile:
        tile -= 1

    kernel = functools.partial(_resblock_kernel, C=C, K=K, Wout=Wout,
                               downsample=downsample)
    return pl.pallas_call(
        kernel,
        out_shape=jax.ShapeDtypeStruct((BH, Wout, C), x_rows.dtype),
        grid_spec=pltpu.PrefetchScalarGridSpec(
            num_scalar_prefetch=0,
            grid=(BH // tile,),
            in_specs=[
                pl.BlockSpec((tile,) + xin.shape[1:], lambda i: (i, 0, 0)),
                # weights / BN params: constant index_map -> DMA'd once
                pl.BlockSpec(prep["w1"].shape, lambda i: (0, 0)),
                pl.BlockSpec(prep["s1"].shape, lambda i: (0, 0)),
                pl.BlockSpec(prep["b1"].shape, lambda i: (0, 0)),
                pl.BlockSpec(prep["w2"].shape, lambda i: (0, 0)),
                pl.BlockSpec(prep["s2"].shape, lambda i: (0, 0)),
                pl.BlockSpec(prep["b2"].shape, lambda i: (0, 0)),
            ],
            out_specs=pl.BlockSpec((tile, Wout, C), lambda i: (i, 0, 0)),
            scratch_shapes=[pltpu.VMEM((tile, Wout, K * C), prep["w1"].dtype)],
        ),
        compiler_params=pltpu.CompilerParams(
            dimension_semantics=("parallel",),     # use both TCs on v7x
            vmem_limit_bytes=32 * 1024 * 1024,
        ),
    )(xin, prep["w1"], prep["s1"], prep["b1"],
      prep["w2"], prep["s2"], prep["b2"])


# ---------------------------------------------------------------------------
# NCHW wrapper matching the PyTorch module interface (layout conversion only)
# ---------------------------------------------------------------------------
def my_residual_block(x_nchw, prep, *, downsample):
    B, C, H, W = x_nchw.shape
    x_rows = jnp.transpose(x_nchw, (0, 2, 3, 1)).reshape(B * H, W, C)
    y = residual_block_cl(x_rows, prep, downsample=downsample)
    Wout = y.shape[1]
    return jnp.transpose(y.reshape(B, H, Wout, C), (0, 3, 1, 2))   # (B, C, H, Wout)


# ---------------------------------------------------------------------------
# Pure-JAX (XLA) reference of MyResidualBlock.forward (eval mode)
# ---------------------------------------------------------------------------
def reference_block(x, raw, *, downsample):
    stride = 2 if downsample else 1
    dn = ("NCHW", "OIHW", "NCHW")
    K = raw["w1"].shape[3]
    P = (K - 1) // 2

    def conv(v, w, s, p):
        return jax.lax.conv_general_dilated(
            v, w, window_strides=(1, s), padding=((0, 0), (p, p)),
            dimension_numbers=dn, precision=jax.lax.Precision.HIGHEST)

    def bn(v, stats):
        gamma, beta, mean, var = stats
        s = (gamma / jnp.sqrt(var + 1e-5)).reshape(1, -1, 1, 1)
        return (v - mean.reshape(1, -1, 1, 1)) * s + beta.reshape(1, -1, 1, 1)

    def lrelu(v):
        return jnp.where(v >= 0, v, 0.01 * v)

    identity = x
    h = lrelu(bn(conv(x, raw["w1"], stride, P), raw["bn1"]))
    h = lrelu(bn(conv(h, raw["w2"], 1, P), raw["bn2"]))
    if downsample:
        identity = 0.5 * (identity[:, :, :, 0::2] + identity[:, :, :, 1::2])
        identity = conv(identity, raw["wid"], 1, 0)
    return h + identity


# ---------------------------------------------------------------------------
if __name__ == "__main__":
    B, C, H, W, K = 2, 32, 1, 64, 9        # complexity=32, ECG-style (B, C, 1, W)

    key = jax.random.PRNGKey(0)
    ks = list(jax.random.split(key, 6))

    def nrm(k, shape, scale):
        return scale * jax.random.normal(k, shape, jnp.float32)

    def bn_stats(k):
        k1, k2, k3, k4 = jax.random.split(k, 4)
        return (1.0 + 0.1 * jax.random.normal(k1, (C,), jnp.float32),   # gamma
                0.1 * jax.random.normal(k2, (C,), jnp.float32),         # beta
                0.1 * jax.random.normal(k3, (C,), jnp.float32),         # running_mean
                0.5 + jax.random.uniform(k4, (C,), jnp.float32))        # running_var

    raw = {
        "w1": nrm(ks[0], (C, C, 1, K), 1.0 / math.sqrt(C * K)),
        "bn1": bn_stats(ks[1]),
        "w2": nrm(ks[2], (C, C, 1, K), 1.0 / math.sqrt(C * K)),
        "bn2": bn_stats(ks[3]),
        "wid": nrm(ks[4], (C, C, 1, 1), 1.0 / math.sqrt(C)),
    }
    x = jax.random.normal(ks[5], (B, C, H, W), jnp.float32)

    # ---- f32 operands: tight tolerance catches layout / tap-math regressions
    for downsample in (True, False):
        ref = reference_block(x, raw, downsample=downsample)
        Wexp = W // 2 if downsample else W
        prep32 = prepare_params(raw, downsample=downsample,
                                compute_dtype=jnp.float32)
        fwd = jax.jit(functools.partial(my_residual_block, downsample=downsample))
        y = jax.block_until_ready(fwd(x, prep32))
        assert y.shape == (B, C, H, Wexp)
        assert bool(jnp.all(jnp.isfinite(y)))
        err = float(jnp.max(jnp.abs(y - ref)))
        assert err < 1e-4, f"f32 mismatch (downsample={downsample}): {err}"

    # ---- bf16 operands (recommended perf default: half the im2col VMEM/store
    # traffic, 2x MXU rate on v6e/v7x; f32 accumulate + f32 epilogue). Looser
    # tolerance because the fused identity/residual path also rounds to bf16.
    prep_bf = prepare_params(raw, downsample=True)          # bf16 default
    fwd_bf = jax.jit(functools.partial(my_residual_block, downsample=True))
    y_bf = jax.block_until_ready(fwd_bf(x, prep_bf))
    assert bool(jnp.all(jnp.isfinite(y_bf)))
    err_bf = float(jnp.max(jnp.abs(y_bf - reference_block(x, raw, downsample=True))))
    assert err_bf < 1e-1, f"bf16 mismatch: {err_bf}"

    print("KERNEL_OK")
</pallas_src>

<mosaic_0001>
module attributes {stable_mosaic.version = 11 : i64} {
  func.func @_resblock_kernel(%arg0: i32, %arg1: memref<2x32x64xf32, #tpu.memory_space<vmem>>, %arg2: memref<288x64xf32, #tpu.memory_space<vmem>>, %arg3: memref<1x32xf32, #tpu.memory_space<vmem>>, %arg4: memref<1x32xf32, #tpu.memory_space<vmem>>, %arg5: memref<288x32xf32, #tpu.memory_space<vmem>>, %arg6: memref<1x32xf32, #tpu.memory_space<vmem>>, %arg7: memref<1x32xf32, #tpu.memory_space<vmem>>, %arg8: memref<2x32x32xf32, #tpu.memory_space<vmem>>, %arg9: memref<2x32x288xf32, #tpu.memory_space<vmem>>) attributes {dimension_semantics = [#tpu.dimension_semantics<parallel>], iteration_bounds = array<i64: 1>, scalar_prefetch = 0 : i64, scratch_operands = 1 : i64, tpu.core_type = #tpu.core_type<tc>, window_params = [{transform_indices = @transform_0, window_bounds = array<i64: 2, 32, 64>}, {pipeline_mode = #tpu.pipeline_mode<synchronous>, transform_indices = @transform_1, window_bounds = array<i64: 288, 64>}, {pipeline_mode = #tpu.pipeline_mode<synchronous>, transform_indices = @transform_2, window_bounds = array<i64: 1, 32>}, {pipeline_mode = #tpu.pipeline_mode<synchronous>, transform_indices = @transform_3, window_bounds = array<i64: 1, 32>}, {pipeline_mode = #tpu.pipeline_mode<synchronous>, transform_indices = @transform_4, window_bounds = array<i64: 288, 32>}, {pipeline_mode = #tpu.pipeline_mode<synchronous>, transform_indices = @transform_5, window_bounds = array<i64: 1, 32>}, {pipeline_mode = #tpu.pipeline_mode<synchronous>, transform_indices = @transform_6, window_bounds = array<i64: 1, 32>}, {transform_indices = @transform_7, window_bounds = array<i64: 2, 32, 32>}]} {
    %cst = arith.constant 0.000000e+00 : f32
    %0 = vector.broadcast %cst : f32 to vector<2x2x32xf32>
    %c0 = arith.constant 0 : index
    %c0_0 = arith.constant 0 : index
    %c0_1 = arith.constant 0 : index
    %1 = vector.load %arg9[%c0, %c0_0, %c0_1] : memref<2x32x288xf32, #tpu.memory_space<vmem>>, vector<2x2x32xf32>
    tpu.vector_store %arg9[%c0, %c0_0, %c0_1], %0 {strides = array<i32>} : memref<2x32x288xf32, #tpu.memory_space<vmem>>, vector<2x2x32xf32>,
    %c0_2 = arith.constant 0 : index
    %c0_3 = arith.constant 0 : index
    %c0_4 = arith.constant 0 : index
    %2 = vector.load %arg1[%c0_2, %c0_3, %c0_4] : memref<2x32x64xf32, #tpu.memory_space<vmem>>, vector<2x30x32xf32>
    %c0_5 = arith.constant 0 : index
    %c2 = arith.constant 2 : index
    %c0_6 = arith.constant 0 : index
    %3 = vector.load %arg9[%c0_5, %c2, %c0_6] : memref<2x32x288xf32, #tpu.memory_space<vmem>>, vector<2x30x32xf32>
    tpu.vector_store %arg9[%c0_5, %c2, %c0_6], %2 {strides = array<i32>} : memref<2x32x288xf32, #tpu.memory_space<vmem>>, vector<2x30x32xf32>,
    %cst_7 = arith.constant 0.000000e+00 : f32
    %4 = vector.broadcast %cst_7 : f32 to vector<2x2x32xf32>
    %c0_8 = arith.constant 0 : index
    %c0_9 = arith.constant 0 : index
    %c32 = arith.constant 32 : index
    %5 = vector.load %arg9[%c0_8, %c0_9, %c32] : memref<2x32x288xf32, #tpu.memory_space<vmem>>, vector<2x2x32xf32>
    tpu.vector_store %arg9[%c0_8, %c0_9, %c32], %4 {strides = array<i32>} : memref<2x32x288xf32, #tpu.memory_space<vmem>>, vector<2x2x32xf32>,
    %c0_10 = arith.constant 0 : index
    %c0_11 = arith.constant 0 : index
    %c32_12 = arith.constant 32 : index
    %6 = vector.load %arg1[%c0_10, %c0_11, %c32_12] : memref<2x32x64xf32, #tpu.memory_space<vmem>>, vector<2x30x32xf32>
    %c0_13 = arith.constant 0 : index
    %c2_14 = arith.constant 2 : index
    %c32_15 = arith.constant 32 : index
    %7 = vector.load %arg9[%c0_13, %c2_14, %c32_15] : memref<2x32x288xf32, #tpu.memory_space<vmem>>, vector<2x30x32xf32>
    tpu.vector_store %arg9[%c0_13, %c2_14, %c32_15], %6 {strides = array<i32>} : memref<2x32x288xf32, #tpu.memory_space<vmem>>, vector<2x30x32xf32>,
    %cst_16 = arith.constant 0.000000e+00 : f32
    %8 = vector.broadcast %cst_16 : f32 to vector<2x1x32xf32>
    %c0_17 = arith.constant 0 : index
    %c0_18 = arith.constant 0 : index
    %c64 = arith.constant 64 : index
    %9 = vector.load %arg9[%c0_17, %c0_18, %c64] : memref<2x32x288xf32, #tpu.memory_space<vmem>>, vector<2x1x32xf32>
    tpu.vector_store %arg9[%c0_17, %c0_18, %c64], %8 {strides = array<i32>} : memref<2x32x288xf32, #tpu.memory_space<vmem>>, vector<2x1x32xf32>,
    %c0_19 = arith.constant 0 : index
    %c0_20 = arith.constant 0 : index
    %c0_21 = arith.constant 0 : index
    %10 = vector.load %arg1[%c0_19, %c0_20, %c0_21] : memref<2x32x64xf32, #tpu.memory_space<vmem>>, vector<2x31x32xf32>
    %c0_22 = arith.constant 0 : index
    %c1 = arith.constant 1 : index
    %c64_23 = arith.constant 64 : index
    %11 = vector.load %arg9[%c0_22, %c1, %c64_23] : memref<2x32x288xf32, #tpu.memory_space<vmem>>, vector<2x31x32xf32>
    tpu.vector_store %arg9[%c0_22, %c1, %c64_23], %10 {strides = array<i32>} : memref<2x32x288xf32, #tpu.memory_space<vmem>>, vector<2x31x32xf32>,
    %cst_24 = arith.constant 0.000000e+00 : f32
    %12 = vector.broadcast %cst_24 : f32 to vector<2x1x32xf32>
    %c0_25 = arith.constant 0 : index
    %c0_26 = arith.constant 0 : index
    %c96 = arith.constant 96 : index
    %13 = vector.load %arg9[%c0_25, %c0_26, %c96] : memref<2x32x288xf32, #tpu.memory_space<vmem>>, vector<2x1x32xf32>
    tpu.vector_store %arg9[%c0_25, %c0_26, %c96], %12 {strides = array<i32>} : memref<2x32x288xf32, #tpu.memory_space<vmem>>, vector<2x1x32xf32>,
    %c0_27 = arith.constant 0 : index
    %c0_28 = arith.constant 0 : index
    %c32_29 = arith.constant 32 : index
    %14 = vector.load %arg1[%c0_27, %c0_28, %c32_29] : memref<2x32x64xf32, #tpu.memory_space<vmem>>, vector<2x31x32xf32>
    %c0_30 = arith.constant 0 : index
    %c1_31 = arith.constant 1 : index
    %c96_32 = arith.constant 96 : index
    %15 = vector.load %arg9[%c0_30, %c1_31, %c96_32] : memref<2x32x288xf32, #tpu.memory_space<vmem>>, vector<2x31x32xf32>
    tpu.vector_store %arg9[%c0_30, %c1_31, %c96_32], %14 {strides = array<i32>} : memref<2x32x288xf32, #tpu.memory_space<vmem>>, vector<2x31x32xf32>,
    %c0_33 = arith.constant 0 : index
    %c0_34 = arith.constant 0 : index
    %c0_35 = arith.constant 0 : index
    %16 = vector.load %arg1[%c0_33, %c0_34, %c0_35] : memref<2x32x64xf32, #tpu.memory_space<vmem>>, vector<2x32x32xf32>
    %c0_36 = arith.constant 0 : index
    %c0_37 = arith.constant 0 : index
    %c128 = arith.constant 128 : index
    %17 = vector.load %arg9[%c0_36, %c0_37, %c128] : memref<2x32x288xf32, #tpu.memory_space<vmem>>, vector<2x32x32xf32>
    tpu.vector_store %arg9[%c0_36, %c0_37, %c128], %16 {strides = array<i32>} : memref<2x32x288xf32, #tpu.memory_space<vmem>>, vector<2x32x32xf32>,
    %c0_38 = arith.constant 0 : index
    %c0_39 = arith.constant 0 : index
    %c32_40 = arith.constant 32 : index
    %18 = vector.load %arg1[%c0_38, %c0_39, %c32_40] : memref<2x32x64xf32, #tpu.memory_space<vmem>>, vector<2x32x32xf32>
    %c0_41 = arith.constant 0 : index
    %c0_42 = arith.constant 0 : index
    %c160 = arith.constant 160 : index
    %19 = vector.load %arg9[%c0_41, %c0_42, %c160] : memref<2x32x288xf32, #tpu.memory_space<vmem>>, vector<2x32x32xf32>
    tpu.vector_store %arg9[%c0_41, %c0_42, %c160], %18 {strides = array<i32>} : memref<2x32x288xf32, #tpu.memory_space<vmem>>, vector<2x32x32xf32>,
    %cst_43 = arith.constant 0.000000e+00 : f32
    %20 = vector.broadcast %cst_43 : f32 to vector<2x1x32xf32>
    %c0_44 = arith.constant 0 : index
    %c31 = arith.constant 31 : index
    %c192 = arith.constant 192 : index
    %21 = vector.load %arg9[%c0_44, %c31, %c192] : memref<2x32x288xf32, #tpu.memory_space<vmem>>, vector<2x1x32xf32>
    tpu.vector_store %arg9[%c0_44, %c31, %c192], %20 {strides = array<i32>} : memref<2x32x288xf32, #tpu.memory_space<vmem>>, vector<2x1x32xf32>,
    %c0_45 = arith.constant 0 : index
    %c1_46 = arith.constant 1 : index
    %c0_47 = arith.constant 0 : index
    %22 = vector.load %arg1[%c0_45, %c1_46, %c0_47] : memref<2x32x64xf32, #tpu.memory_space<vmem>>, vector<2x31x32xf32>
    %c0_48 = arith.constant 0 : index
    %c0_49 = arith.constant 0 : index
    %c192_50 = arith.constant 192 : index
    %23 = vector.load %arg9[%c0_48, %c0_49, %c192_50] : memref<2x32x288xf32, #tpu.memory_space<vmem>>, vector<2x31x32xf32>
    tpu.vector_store %arg9[%c0_48, %c0_49, %c192_50], %22 {strides = array<i32>} : memref<2x32x288xf32, #tpu.memory_space<vmem>>, vector<2x31x32xf32>,
    %cst_51 = arith.constant 0.000000e+00 : f32
    %24 = vector.broadcast %cst_51 : f32 to vector<2x1x32xf32>
    %c0_52 = arith.constant 0 : index
    %c31_53 = arith.constant 31 : index
    %c224 = arith.constant 224 : index
    %25 = vector.load %arg9[%c0_52, %c31_53, %c224] : memref<2x32x288xf32, #tpu.memory_space<vmem>>, vector<2x1x32xf32>
    tpu.vector_store %arg9[%c0_52, %c31_53, %c224], %24 {strides = array<i32>} : memref<2x32x288xf32, #tpu.memory_space<vmem>>, vector<2x1x32xf32>,
    %c0_54 = arith.constant 0 : index
    %c1_55 = arith.constant 1 : index
    %c32_56 = arith.constant 32 : index
    %26 = vector.load %arg1[%c0_54, %c1_55, %c32_56] : memref<2x32x64xf32, #tpu.memory_space<vmem>>, vector<2x31x32xf32>
    %c0_57 = arith.constant 0 : index
    %c0_58 = arith.constant 0 : index
    %c224_59 = arith.constant 224 : index
    %27 = vector.load %arg9[%c0_57, %c0_58, %c224_59] : memref<2x32x288xf32, #tpu.memory_space<vmem>>, vector<2x31x32xf32>
    tpu.vector_store %arg9[%c0_57, %c0_58, %c224_59], %26 {strides = array<i32>} : memref<2x32x288xf32, #tpu.memory_space<vmem>>, vector<2x31x32xf32>,
    %cst_60 = arith.constant 0.000000e+00 : f32
    %28 = vector.broadcast %cst_60 : f32 to vector<2x2x32xf32>
    %c0_61 = arith.constant 0 : index
    %c30 = arith.constant 30 : index
    %c256 = arith.constant 256 : index
    %29 = vector.load %arg9[%c0_61, %c30, %c256] : memref<2x32x288xf32, #tpu.memory_space<vmem>>, vector<2x2x32xf32>
    tpu.vector_store %arg9[%c0_61, %c30, %c256], %28 {strides = array<i32>} : memref<2x32x288xf32, #tpu.memory_space<vmem>>, vector<2x2x32xf32>,
    %c0_62 = arith.constant 0 : index
    %c2_63 = arith.constant 2 : index
    %c0_64 = arith.constant 0 : index
    %30 = vector.load %arg1[%c0_62, %c2_63, %c0_64] : memref<2x32x64xf32, #tpu.memory_space<vmem>>, vector<2x30x32xf32>
    %c0_65 = arith.constant 0 : index
    %c0_66 = arith.constant 0 : index
    %c256_67 = arith.constant 256 : index
    %31 = vector.load %arg9[%c0_65, %c0_66, %c256_67] : memref<2x32x288xf32, #tpu.memory_space<vmem>>, vector<2x30x32xf32>
    tpu.vector_store %arg9[%c0_65, %c0_66, %c256_67], %30 {strides = array<i32>} : memref<2x32x288xf32, #tpu.memory_space<vmem>>, vector<2x30x32xf32>,
    %c0_68 = arith.constant 0 : index
    %c0_69 = arith.constant 0 : index
    %c0_70 = arith.constant 0 : index
    %32 = vector.load %arg9[%c0_68, %c0_69, %c0_70] : memref<2x32x288xf32, #tpu.memory_space<vmem>>, vector<2x32x288xf32>
    %33 = vector.shape_cast %32 : vector<2x32x288xf32> to vector<64x288xf32>
    %c0_71 = arith.constant 0 : index
    %c0_72 = arith.constant 0 : index
    %34 = vector.load %arg2[%c0_71, %c0_72] : memref<288x64xf32, #tpu.memory_space<vmem>>, vector<288x64xf32>
    %cst_73 = arith.constant dense<0.000000e+00> : vector<64x64xf32>
    %35 = tpu.matmul %33, %34, %cst_73 {dimension_numbers = #tpu.dot_dimension_numbers<[1], [0], [0], [1], [0, 0, 1, 1], [], []>} : vector<64x288xf32>, vector<288x64xf32>, vector<64x64xf32> -> vector<64x64xf32>
    %36 = vector.extract_strided_slice %35 {offsets = [0, 0], sizes = [64, 32], strides = [1, 1]} : vector<64x64xf32> to vector<64x32xf32>
    %c0_74 = arith.constant 0 : index
    %c0_75 = arith.constant 0 : index
    %37 = vector.load %arg3[%c0_74, %c0_75] : memref<1x32xf32, #tpu.memory_space<vmem>>, vector<1x32xf32>
    %38 = vector.broadcast %37 : vector<1x32xf32> to vector<64x32xf32>
    %39 = arith.mulf %36, %38 : vector<64x32xf32>
    %c0_76 = arith.constant 0 : index
    %c0_77 = arith.constant 0 : index
    %40 = vector.load %arg4[%c0_76, %c0_77] : memref<1x32xf32, #tpu.memory_space<vmem>>, vector<1x32xf32>
    %41 = vector.broadcast %40 : vector<1x32xf32> to vector<64x32xf32>
    %42 = arith.addf %39, %41 : vector<64x32xf32>
    %cst_78 = arith.constant 0.00999999977 : f32
    %43 = vector.broadcast %cst_78 : f32 to vector<64x32xf32>
    %44 = arith.mulf %43, %42 : vector<64x32xf32>
    %45 = arith.maximumf %42, %44 : vector<64x32xf32>
    %46 = vector.extract_strided_slice %35 {offsets = [0, 32], sizes = [64, 32], strides = [1, 1]} : vector<64x64xf32> to vector<64x32xf32>
    %47 = vector.shape_cast %45 : vector<64x32xf32> to vector<2x32x32xf32>
    %cst_79 = arith.constant 0.000000e+00 : f32
    %48 = vector.broadcast %cst_79 : f32 to vector<2x4x32xf32>
    %c0_80 = arith.constant 0 : index
    %c0_81 = arith.constant 0 : index
    %c0_82 = arith.constant 0 : index
    %49 = vector.load %arg9[%c0_80, %c0_81, %c0_82] : memref<2x32x288xf32, #tpu.memory_space<vmem>>, vector<2x4x32xf32>
    tpu.vector_store %arg9[%c0_80, %c0_81, %c0_82], %48 {strides = array<i32>} : memref<2x32x288xf32, #tpu.memory_space<vmem>>, vector<2x4x32xf32>,
    %50 = vector.extract_strided_slice %47 {offsets = [0, 0, 0], sizes = [2, 28, 32], strides = [1, 1, 1]} : vector<2x32x32xf32> to vector<2x28x32xf32>
    %c0_83 = arith.constant 0 : index
    %c4 = arith.constant 4 : index
    %c0_84 = arith.constant 0 : index
    %51 = vector.load %arg9[%c0_83, %c4, %c0_84] : memref<2x32x288xf32, #tpu.memory_space<vmem>>, vector<2x28x32xf32>
    tpu.vector_store %arg9[%c0_83, %c4, %c0_84], %50 {strides = array<i32>} : memref<2x32x288xf32, #tpu.memory_space<vmem>>, vector<2x28x32xf32>,
    %cst_85 = arith.constant 0.000000e+00 : f32
    %52 = vector.broadcast %cst_85 : f32 to vector<2x3x32xf32>
    %c0_86 = arith.constant 0 : index
    %c0_87 = arith.constant 0 : index
    %c32_88 = arith.constant 32 : index
    %53 = vector.load %arg9[%c0_86, %c0_87, %c32_88] : memref<2x32x288xf32, #tpu.memory_space<vmem>>, vector<2x3x32xf32>
    tpu.vector_store %arg9[%c0_86, %c0_87, %c32_88], %52 {strides = array<i32>} : memref<2x32x288xf32, #tpu.memory_space<vmem>>, vector<2x3x32xf32>,
    %54 = vector.extract_strided_slice %47 {offsets = [0, 0, 0], sizes = [2, 29, 32], strides = [1, 1, 1]} : vector<2x32x32xf32> to vector<2x29x32xf32>
    %c0_89 = arith.constant 0 : index
    %c3 = arith.constant 3 : index
    %c32_90 = arith.constant 32 : index
    %55 = vector.load %arg9[%c0_89, %c3, %c32_90] : memref<2x32x288xf32, #tpu.memory_space<vmem>>, vector<2x29x32xf32>
    tpu.vector_store %arg9[%c0_89, %c3, %c32_90], %54 {strides = array<i32>} : memref<2x32x288xf32, #tpu.memory_space<vmem>>, vector<2x29x32xf32>,
    %cst_91 = arith.constant 0.000000e+00 : f32
    %56 = vector.broadcast %cst_91 : f32 to vector<2x2x32xf32>
    %c0_92 = arith.constant 0 : index
    %c0_93 = arith.constant 0 : index
    %c64_94 = arith.constant 64 : index
    %57 = vector.load %arg9[%c0_92, %c0_93, %c64_94] : memref<2x32x288xf32, #tpu.memory_space<vmem>>, vector<2x2x32xf32>
    tpu.vector_store %arg9[%c0_92, %c0_93, %c64_94], %56 {strides = array<i32>} : memref<2x32x288xf32, #tpu.memory_space<vmem>>, vector<2x2x32xf32>,
    %58 = vector.extract_strided_slice %47 {offsets = [0, 0, 0], sizes = [2, 30, 32], strides = [1, 1, 1]} : vector<2x32x32xf32> to vector<2x30x32xf32>
    %c0_95 = arith.constant 0 : index
    %c2_96 = arith.constant 2 : index
    %c64_97 = arith.constant 64 : index
    %59 = vector.load %arg9[%c0_95, %c2_96, %c64_97] : memref<2x32x288xf32, #tpu.memory_space<vmem>>, vector<2x30x32xf32>
    tpu.vector_store %arg9[%c0_95, %c2_96, %c64_97], %58 {strides = array<i32>} : memref<2x32x288xf32, #tpu.memory_space<vmem>>, vector<2x30x32xf32>,
    %cst_98 = arith.constant 0.000000e+00 : f32
    %60 = vector.broadcast %cst_98 : f32 to vector<2x1x32xf32>
    %c0_99 = arith.constant 0 : index
    %c0_100 = arith.constant 0 : index
    %c96_101 = arith.constant 96 : index
    %61 = vector.load %arg9[%c0_99, %c0_100, %c96_101] : memref<2x32x288xf32, #tpu.memory_space<vmem>>, vector<2x1x32xf32>
    tpu.vector_store %arg9[%c0_99, %c0_100, %c96_101], %60 {strides = array<i32>} : memref<2x32x288xf32, #tpu.memory_space<vmem>>, vector<2x1x32xf32>,
    %62 = vector.extract_strided_slice %47 {offsets = [0, 0, 0], sizes = [2, 31, 32], strides = [1, 1, 1]} : vector<2x32x32xf32> to vector<2x31x32xf32>
    %c0_102 = arith.constant 0 : index
    %c1_103 = arith.constant 1 : index
    %c96_104 = arith.constant 96 : index
    %63 = vector.load %arg9[%c0_102, %c1_103, %c96_104] : memref<2x32x288xf32, #tpu.memory_space<vmem>>, vector<2x31x32xf32>
    tpu.vector_store %arg9[%c0_102, %c1_103, %c96_104], %62 {strides = array<i32>} : memref<2x32x288xf32, #tpu.memory_space<vmem>>, vector<2x31x32xf32>,
    %c0_105 = arith.constant 0 : index
    %c0_106 = arith.constant 0 : index
    %c128_107 = arith.constant 128 : index
    %64 = vector.load %arg9[%c0_105, %c0_106, %c128_107] : memref<2x32x288xf32, #tpu.memory_space<vmem>>, vector<2x32x32xf32>
    tpu.vector_store %arg9[%c0_105, %c0_106, %c128_107], %47 {strides = array<i32>} : memref<2x32x288xf32, #tpu.memory_space<vmem>>, vector<2x32x32xf32>,
    %cst_108 = arith.constant 0.000000e+00 : f32
    %65 = vector.broadcast %cst_108 : f32 to vector<2x1x32xf32>
    %c0_109 = arith.constant 0 : index
    %c31_110 = arith.constant 31 : index
    %c160_111 = arith.constant 160 : index
    %66 = vector.load %arg9[%c0_109, %c31_110, %c160_111] : memref<2x32x288xf32, #tpu.memory_space<vmem>>, vector<2x1x32xf32>
    tpu.vector_store %arg9[%c0_109, %c31_110, %c160_111], %65 {strides = array<i32>} : memref<2x32x288xf32, #tpu.memory_space<vmem>>, vector<2x1x32xf32>,
    %67 = vector.extract_strided_slice %47 {offsets = [0, 1, 0], sizes = [2, 31, 32], strides = [1, 1, 1]} : vector<2x32x32xf32> to vector<2x31x32xf32>
    %c0_112 = arith.constant 0 : index
    %c0_113 = arith.constant 0 : index
    %c160_114 = arith.constant 160 : index
    %68 = vector.load %arg9[%c0_112, %c0_113, %c160_114] : memref<2x32x288xf32, #tpu.memory_space<vmem>>, vector<2x31x32xf32>
    tpu.vector_store %arg9[%c0_112, %c0_113, %c160_114], %67 {strides = array<i32>} : memref<2x32x288xf32, #tpu.memory_space<vmem>>, vector<2x31x32xf32>,
    %cst_115 = arith.constant 0.000000e+00 : f32
    %69 = vector.broadcast %cst_115 : f32 to vector<2x2x32xf32>
    %c0_116 = arith.constant 0 : index
    %c30_117 = arith.constant 30 : index
    %c192_118 = arith.constant 192 : index
    %70 = vector.load %arg9[%c0_116, %c30_117, %c192_118] : memref<2x32x288xf32, #tpu.memory_space<vmem>>, vector<2x2x32xf32>
    tpu.vector_store %arg9[%c0_116, %c30_117, %c192_118], %69 {strides = array<i32>} : memref<2x32x288xf32, #tpu.memory_space<vmem>>, vector<2x2x32xf32>,
    %71 = vector.extract_strided_slice %47 {offsets = [0, 2, 0], sizes = [2, 30, 32], strides = [1, 1, 1]} : vector<2x32x32xf32> to vector<2x30x32xf32>
    %c0_119 = arith.constant 0 : index
    %c0_120 = arith.constant 0 : index
    %c192_121 = arith.constant 192 : index
    %72 = vector.load %arg9[%c0_119, %c0_120, %c192_121] : memref<2x32x288xf32, #tpu.memory_space<vmem>>, vector<2x30x32xf32>
    tpu.vector_store %arg9[%c0_119, %c0_120, %c192_121], %71 {strides = array<i32>} : memref<2x32x288xf32, #tpu.memory_space<vmem>>, vector<2x30x32xf32>,
    %cst_122 = arith.constant 0.000000e+00 : f32
    %73 = vector.broadcast %cst_122 : f32 to vector<2x3x32xf32>
    %c0_123 = arith.constant 0 : index
    %c29 = arith.constant 29 : index
    %c224_124 = arith.constant 224 : index
    %74 = vector.load %arg9[%c0_123, %c29, %c224_124] : memref<2x32x288xf32, #tpu.memory_space<vmem>>, vector<2x3x32xf32>
    tpu.vector_store %arg9[%c0_123, %c29, %c224_124], %73 {strides = array<i32>} : memref<2x32x288xf32, #tpu.memory_space<vmem>>, vector<2x3x32xf32>,
    %75 = vector.extract_strided_slice %47 {offsets = [0, 3, 0], sizes = [2, 29, 32], strides = [1, 1, 1]} : vector<2x32x32xf32> to vector<2x29x32xf32>
    %c0_125 = arith.constant 0 : index
    %c0_126 = arith.constant 0 : index
    %c224_127 = arith.constant 224 : index
    %76 = vector.load %arg9[%c0_125, %c0_126, %c224_127] : memref<2x32x288xf32, #tpu.memory_space<vmem>>, vector<2x29x32xf32>
    tpu.vector_store %arg9[%c0_125, %c0_126, %c224_127], %75 {strides = array<i32>} : memref<2x32x288xf32, #tpu.memory_space<vmem>>, vector<2x29x32xf32>,
    %cst_128 = arith.constant 0.000000e+00 : f32
    %77 = vector.broadcast %cst_128 : f32 to vector<2x4x32xf32>
    %c0_129 = arith.constant 0 : index
    %c28 = arith.constant 28 : index
    %c256_130 = arith.constant 256 : index
    %78 = vector.load %arg9[%c0_129, %c28, %c256_130] : memref<2x32x288xf32, #tpu.memory_space<vmem>>, vector<2x4x32xf32>
    tpu.vector_store %arg9[%c0_129, %c28, %c256_130], %77 {strides = array<i32>} : memref<2x32x288xf32, #tpu.memory_space<vmem>>, vector<2x4x32xf32>,
    %79 = vector.extract_strided_slice %47 {offsets = [0, 4, 0], sizes = [2, 28, 32], strides = [1, 1, 1]} : vector<2x32x32xf32> to vector<2x28x32xf32>
    %c0_131 = arith.constant 0 : index
    %c0_132 = arith.constant 0 : index
    %c256_133 = arith.constant 256 : index
    %80 = vector.load %arg9[%c0_131, %c0_132, %c256_133] : memref<2x32x288xf32, #tpu.memory_space<vmem>>, vector<2x28x32xf32>
    tpu.vector_store %arg9[%c0_131, %c0_132, %c256_133], %79 {strides = array<i32>} : memref<2x32x288xf32, #tpu.memory_space<vmem>>, vector<2x28x32xf32>,
    %c0_134 = arith.constant 0 : index
    %c0_135 = arith.constant 0 : index
    %c0_136 = arith.constant 0 : index
    %81 = vector.load %arg9[%c0_134, %c0_135, %c0_136] : memref<2x32x288xf32, #tpu.memory_space<vmem>>, vector<2x32x288xf32>
    %82 = vector.shape_cast %81 : vector<2x32x288xf32> to vector<64x288xf32>
    %c0_137 = arith.constant 0 : index
    %c0_138 = arith.constant 0 : index
    %83 = vector.load %arg5[%c0_137, %c0_138] : memref<288x32xf32, #tpu.memory_space<vmem>>, vector<288x32xf32>
    %cst_139 = arith.constant dense<0.000000e+00> : vector<64x32xf32>
    %84 = tpu.matmul %82, %83, %cst_139 {dimension_numbers = #tpu.dot_dimension_numbers<[1], [0], [0], [1], [0, 0, 1, 1], [], []>} : vector<64x288xf32>, vector<288x32xf32>, vector<64x32xf32> -> vector<64x32xf32>
    %c0_140 = arith.constant 0 : index
    %c0_141 = arith.constant 0 : index
    %85 = vector.load %arg6[%c0_140, %c0_141] : memref<1x32xf32, #tpu.memory_space<vmem>>, vector<1x32xf32>
    %86 = vector.broadcast %85 : vector<1x32xf32> to vector<64x32xf32>
    %87 = arith.mulf %84, %86 : vector<64x32xf32>
    %c0_142 = arith.constant 0 : index
    %c0_143 = arith.constant 0 : index
    %88 = vector.load %arg7[%c0_142, %c0_143] : memref<1x32xf32, #tpu.memory_space<vmem>>, vector<1x32xf32>
    %89 = vector.broadcast %88 : vector<1x32xf32> to vector<64x32xf32>
    %90 = arith.addf %87, %89 : vector<64x32xf32>
    %cst_144 = arith.constant 0.00999999977 : f32
    %91 = vector.broadcast %cst_144 : f32 to vector<64x32xf32>
    %92 = arith.mulf %91, %90 : vector<64x32xf32>
    %93 = arith.maximumf %90, %92 : vector<64x32xf32>
    %94 = arith.addf %93, %46 : vector<64x32xf32>
    %95 = vector.shape_cast %94 : vector<64x32xf32> to vector<2x32x32xf32>
    %c0_145 = arith.constant 0 : index
    %c0_146 = arith.constant 0 : index
    %c0_147 = arith.constant 0 : index
    %96 = vector.load %arg8[%c0_145, %c0_146, %c0_147] : memref<2x32x32xf32, #tpu.memory_space<vmem>>, vector<2x32x32xf32>
    tpu.vector_store %arg8[%c0_145, %c0_146, %c0_147], %95 {strides = array<i32>} : memref<2x32x32xf32, #tpu.memory_space<vmem>>, vector<2x32x32xf32>,
    return
  }
  func.func @transform_0(%arg0: i32) -> (i32, i32, i32) {
    %c0_i32 = arith.constant 0 : i32
    %c0_i32_0 = arith.constant 0 : i32
    %c0_i32_1 = arith.constant 0 : i32
    return %arg0, %c0_i32, %c0_i32_0 : i32, i32, i32
  }
  func.func @transform_1(%arg0: i32) -> (i32, i32) {
    %c0_i32 = arith.constant 0 : i32
    %c0_i32_0 = arith.constant 0 : i32
    %c0_i32_1 = arith.constant 0 : i32
    return %c0_i32, %c0_i32_0 : i32, i32
  }
  func.func @transform_2(%arg0: i32) -> (i32, i32) {
    %c0_i32 = arith.constant 0 : i32
    %c0_i32_0 = arith.constant 0 : i32
    %c0_i32_1 = arith.constant 0 : i32
    return %c0_i32, %c0_i32_0 : i32, i32
  }
  func.func @transform_3(%arg0: i32) -> (i32, i32) {
    %c0_i32 = arith.constant 0 : i32
    %c0_i32_0 = arith.constant 0 : i32
    %c0_i32_1 = arith.constant 0 : i32
    return %c0_i32, %c0_i32_0 : i32, i32
  }
  func.func @transform_4(%arg0: i32) -> (i32, i32) {
    %c0_i32 = arith.constant 0 : i32
    %c0_i32_0 = arith.constant 0 : i32
    %c0_i32_1 = arith.constant 0 : i32
    return %c0_i32, %c0_i32_0 : i32, i32
  }
  func.func @transform_5(%arg0: i32) -> (i32, i32) {
    %c0_i32 = arith.constant 0 : i32
    %c0_i32_0 = arith.constant 0 : i32
    %c0_i32_1 = arith.constant 0 : i32
    return %c0_i32, %c0_i32_0 : i32, i32
  }
  func.func @transform_6(%arg0: i32) -> (i32, i32) {
    %c0_i32 = arith.constant 0 : i32
    %c0_i32_0 = arith.constant 0 : i32
    %c0_i32_1 = arith.constant 0 : i32
    return %c0_i32, %c0_i32_0 : i32, i32
  }
  func.func @transform_7(%arg0: i32) -> (i32, i32, i32) {
    %c0_i32 = arith.constant 0 : i32
    %c0_i32_0 = arith.constant 0 : i32
    %c0_i32_1 = arith.constant 0 : i32
    return %arg0, %c0_i32, %c0_i32_0 : i32, i32, i32
  }
}

</mosaic_0001>

<bundles_post_ra>
// kernel: my_residual_block.1
= control target key start
LH: loop header
LB: loop body
LE: loop exit
PB: predicated region body
PF: predicated region fallthrough
CT: control target
= control target key end

     0   :  { %vm70_vm0 = vcmask 261120   ;;  %vm121_vm1 = vcmask 523520   ;;  %vm26_vm2 = vcmask 254976   ;;  %s1799_s28 = smov 64   ;;  %v1800_v4 = vmov 0.0   ;;  %s1801_s9 = smov 32   ;;  %s2824_s0 = inlined_call_operand.vmem [shape: f32[2,32,64], index: 0, kind: input, shape index: {}]   ;;  %s2825_s1 = inlined_call_operand.vmem [shape: f32[288,64], index: 1, kind: input, shape index: {}]   ;;  %s2826_s4 = inlined_call_operand.vmem [shape: f32[288,32], index: 4, kind: input, shape index: {}]   ;;  %s2827_s2 = inlined_call_operand.vmem [shape: f32[1,32], index: 2, kind: input, shape index: {}]   ;;  %s2828_s3 = inlined_call_operand.vmem [shape: f32[1,32], index: 3, kind: input, shape index: {}]   ;;  %s2829_s5 = inlined_call_operand.vmem [shape: f32[1,32], index: 5, kind: input, shape index: {}]   ;;  %s2830_s6 = inlined_call_operand.vmem [shape: f32[1,32], index: 6, kind: input, shape index: {}]   ;;  %s2831_s7 = inlined_call_operand.vmem [shape: f32[2,32,32], index: 7, kind: output, shape index: {}]  }
   0x1   :  { %v298_v0 = vld [vmem:[%s2824_s0 + $0x1] sm:$0xff]  ;;  %27 = vst.msk [vmem:[#allocation2] sm:$0x3] %vm26_vm2, %v1800_v4  ;;  %vm78_vm3 = vcmask 517376   ;;  %28 = vst.msk [vmem:[#allocation2 + $0x60] sm:$0x3] %vm26_vm2, %v1800_v4 }
   0x2   :  { %v132_v1 = vld [vmem:[%s2824_s0] sm:$0xff]  ;;  %314 = vrot.lane.b32.xlu0 %v298_v0, %s1799_s28  ;;  %365 = vrot.lane.b32.xlu1 %v298_v0, %s1799_s28  ;;  %v1854_v3 = vld [vmem:[%s2824_s0 + $0x8] sm:$0xff]  ;;  %79 = vst.msk [vmem:[#allocation2] sm:$0x3] %vm78_vm3, %v1800_v4  ;;  %80 = vst.msk [vmem:[#allocation2 + $0x60] sm:$0x3] %vm78_vm3, %v1800_v4 }
   0x3   :  { %v149_v2 = vrot.slane %v132_v1, 7  ;;  %272 = vst.msk [vmem:[#allocation2 + $0x8] sm:$0xff] %vm70_vm0, %v132_v1  ;;  %v150_v5 = vrot.slane %v1854_v3, 7  ;;  %v134_v6 = vld [vmem:[%s2824_s0 + $0x10] sm:$0xff]  ;;  %273 = vst.msk [vmem:[#allocation2 + $0x20] sm:$0xff] %vm70_vm0, %v1854_v3  ;;  %vm148_vm4 = vcmask 1040384  }
   0x4   :  { %288 = vst.msk [vmem:[#allocation2 + $0x8] sm:$0xff] %vm121_vm1, %v132_v1  ;;  %289 = vst.msk [vmem:[#allocation2 + $0x20] sm:$0xff] %vm121_vm1, %v1854_v3  ;;  %v1874_v7 = vld [vmem:[%s2824_s0 + $0x20] sm:$0xff]  ;;  %vm129_vm5 = vcmask 778752   ;;  %v1882_v8 = vld [vmem:[%s2824_s0 + $0x28] sm:$0xff]  ;;  %vm197_vm6 = vcmask 1041152  }
   0x5   :  { %274 = vst.msk [vmem:[#allocation2 + $0x38] sm:$0xff] %vm70_vm0, %v134_v6  ;;  %276 = vst.msk [vmem:[#allocation2 + $0x68] sm:$0xff] %vm70_vm0, %v1874_v7  ;;  %v299_v9 = vld [vmem:[%s2824_s0 + $0x9] sm:$0xff]  ;;  %v151_v10 = vsel %vm148_vm4, %v149_v2, %v150_v5  ;;  %vm68_vm7 = vcmask 261122   ;;  %v458_v12 = vld [vmem:[%s2825_s1 + $0x80] sm:$0xff]  ;;  %vm119_vm8 = vcmask 523522  }
   0x6   :  { %290 = vst.msk [vmem:[#allocation2 + $0x38] sm:$0xff] %vm121_vm1, %v134_v6  ;;  %163 = vrot.lane.b32.xlu0 %v149_v2, %s1799_s28  ;;  %230 = vrot.lane.b32.xlu1 %v149_v2, %s1799_s28  ;;  %v1899_v11 = vld [vmem:[%s2824_s0 + $0x30] sm:$0xff]  ;;  %292 = vst.msk [vmem:[#allocation2 + $0x68] sm:$0xff] %vm121_vm1, %v1874_v7  ;;  %v459_v13 = vld [vmem:[%s2825_s1 + $0x88] sm:$0xff]  ;;  %v46_v15 = vrot.slane %v132_v1, 6  ;;  %v1932_v19 = vrot.slane %v134_v6, 7 }
   0x7   :  { %130 = vst.msk [vmem:[#allocation2] sm:$0x1] %vm129_vm5, %v1800_v4  ;;  %131 = vst.msk [vmem:[#allocation2 + $0x60] sm:$0x1] %vm129_vm5, %v1800_v4  ;;  %v442_v14 = vld [vmem:[%s2825_s1] sm:$0xff]  ;;  %v1711_v16 = vpack.c.bf16 %v459_v13, %v458_v12  ;;  %v443_v17 = vld [vmem:[%s2825_s1 + $0x8] sm:$0xff] }
   0x8   :  { %198 = vst.msk [vmem:[#allocation2] sm:$0x1] %vm197_vm6, %v1800_v4  ;;  %199 = vst.msk [vmem:[#allocation2 + $0x60] sm:$0x1] %vm197_vm6, %v1800_v4  ;;  %v460_v18 = vld [vmem:[%s2825_s1 + $0x90] sm:$0xff]  ;;  %v1713_v20 = vpack.c.bf16 %v443_v17, %v442_v14  ;;  %v461_v21 = vld [vmem:[%s2825_s1 + $0x98] sm:$0xff]  ;;  %v153_v35 = vsel %vm148_vm4, %v150_v5, %v1932_v19 }
   0x9   :  { %277 = vst.msk [vmem:[#allocation2 + $0x80] sm:$0xff] %vm70_vm0, %v1882_v8  ;;  %278 = vst.msk [vmem:[#allocation2 + $0x98] sm:$0xff] %vm70_vm0, %v1899_v11  ;;  %v444_v22 = vld [vmem:[%s2825_s1 + $0x10] sm:$0xff]  ;;  %v445_v23 = vld [vmem:[%s2825_s1 + $0x18] sm:$0xff]  ;;  %vm45_vm9 = vcmask 1041408   ;;  %v47_v24 = vrot.slane %v1854_v3, 6  ;;  %1712 = vmatprep.subr.bf16.mxu0 %v1711_v16  ;;  %v1715_v25 = vpack.c.bf16 %v461_v21, %v460_v18 }
   0xa   :  { %293 = vst.msk [vmem:[#allocation2 + $0x80] sm:$0xff] %vm121_vm1, %v1882_v8  ;;  %294 = vst.msk [vmem:[#allocation2 + $0x98] sm:$0xff] %vm121_vm1, %v1899_v11  ;;  %316 = vrot.lane.b32.xlu0 %v299_v9, %s1799_s28  ;;  %165 = vrot.lane.b32.xlu1 %v151_v10, %s1799_s28  ;;  %v462_v26 = vld [vmem:[%s2825_s1 + $0xa0] sm:$0xff]  ;;  %v463_v27 = vld [vmem:[%s2825_s1 + $0xa8] sm:$0xff]  ;;  %v1952_v28 = vrot.slane %v134_v6, 6  ;;  %v1717_v29 = vpack.c.bf16 %v445_v23, %v444_v22  ;;  %vm398_vm10 = vcmask 261126  }
   0xb   :  { %69 = vst.msk [vmem:[#allocation2] sm:$0xfc] %vm68_vm7, %v46_v15  ;;  %1714 = vmatpush3.bf16.msra.mxu0 %v1713_v20  ;;  %v48_v30 = vsel %vm45_vm9, %v46_v15, %v47_v24  ;;  %v446_v31 = vld [vmem:[%s2825_s1 + $0x20] sm:$0xff]  ;;  %v447_v32 = vld [vmem:[%s2825_s1 + $0x28] sm:$0xff]  ;;  %v300_v34 = vld [vmem:[%s2824_s0 + $0x11] sm:$0xff]  ;;  %v1719_v36 = vpack.c.bf16 %v463_v27, %v462_v26  ;;  %v2026_v57 = vrot.slane %v1874_v7, 6 }
   0xc   :  { %120 = vst.msk [vmem:[#allocation2] sm:$0xfc] %vm119_vm8, %v46_v15  ;;  %v50_v33 = vsel %vm45_vm9, %v47_v24, %v1952_v28  ;;  %1716 = vmatprep.subr.bf16.mxu0 %v1715_v25  ;;  %v135_v37 = vld [vmem:[%s2824_s0 + $0x18] sm:$0x7f]  ;;  %v464_v38 = vld [vmem:[%s2825_s1 + $0xb0] sm:$0xff]  ;;  %v1721_v40 = vpack.c.bf16 %v447_v32, %v446_v31  ;;  %v474_v46 = vld [vmem:[%s2825_s1 + $0x100] sm:$0xff] }
   0xd   :  { %71 = vst.msk [vmem:[#allocation2 + $0x18] sm:$0xff] %vm70_vm0, %v48_v30  ;;  %72 = vst.msk [vmem:[#allocation2 + $0x30] sm:$0xff] %vm70_vm0, %v50_v33  ;;  %v465_v39 = vld [vmem:[%s2825_s1 + $0xb8] sm:$0xff]  ;;  %v448_v41 = vld [vmem:[%s2825_s1 + $0x30] sm:$0xff]  ;;  %v154_v43 = vrot.slane %v135_v37, 7  ;;  %vm412_vm11 = vcmask 259072  }
   0xe   :  { %367 = vrot.lane.b32.xlu0 %v299_v9, %s1799_s28  ;;  %232 = vrot.lane.b32.xlu1 %v151_v10, %s1799_s28  ;;  %399 = vst.msk [vmem:[#allocation2 + $0x58] sm:$0xc0] %vm398_vm10, %v1800_v4  ;;  %400 = vst.msk [vmem:[#allocation2 + $0xb8] sm:$0xc0] %vm398_vm10, %v1800_v4  ;;  %v449_v42 = vld [vmem:[%s2825_s1 + $0x38] sm:$0xff]  ;;  %v1723_v45 = vpack.c.bf16 %v465_v39, %v464_v38  ;;  %v475_v47 = vld [vmem:[%s2825_s1 + $0x108] sm:$0xff] }
   0xf   :  { %122 = vst.msk [vmem:[#allocation2 + $0x18] sm:$0xff] %vm121_vm1, %v48_v30  ;;  %123 = vst.msk [vmem:[#allocation2 + $0x30] sm:$0xff] %vm121_vm1, %v50_v33  ;;  %1718 = vmatpush3.bf16.msra.mxu0 %v1717_v29  ;;  %v203_v44 = vld [vmem:[%s2824_s0 + $0x18] sm:$0x7f]  ;;  %v466_v48 = vld [vmem:[%s2825_s1 + $0xc0] sm:$0xff]  ;;  %v1743_v51 = vpack.c.bf16 %v475_v47, %v474_v46  ;;  %v1725_v53 = vpack.c.bf16 %v449_v42, %v448_v41  ;;  %v155_v62 = vsel %vm148_vm4, %v1932_v19, %v154_v43  ;;  %vm792_vm12 = vcmask 261124  }
  0x10   :  { %1720 = vmatprep.subr.bf16.mxu0 %v1719_v36  ;;  %v467_v49 = vld [vmem:[%s2825_s1 + $0xc8] sm:$0xff]  ;;  %v450_v50 = vld [vmem:[%s2825_s1 + $0x40] sm:$0xff]  ;;  %v301_v52 = vld [vmem:[%s2824_s0 + $0x19] sm:$0x7f]  ;;  %v221_v63 = vrot.slane %v203_v44, 7  ;;  %v156_v25 = vrot.slane %v1874_v7, 7 }
  0x11   :  { %v451_v54 = vld [vmem:[%s2825_s1 + $0x48] sm:$0xff]  ;;  %v476_v55 = vld [vmem:[%s2825_s1 + $0x110] sm:$0xff]  ;;  %v477_v56 = vld [vmem:[%s2825_s1 + $0x118] sm:$0xff]  ;;  %v1727_v0 = vpack.c.bf16 %v467_v49, %v466_v48  ;;  %1744 = vmatprep.subr.bf16.mxu1 %v1743_v51  ;;  %74 = vst.msk [vmem:[#allocation2 + $0x60] sm:$0xfc] %vm68_vm7, %v2026_v57  ;;  %v157_v38 = vrot.slane %v1882_v8, 7 }
  0x12   :  { %318 = vrot.lane.b32.xlu0 %v300_v34, %s1799_s28  ;;  %167 = vrot.lane.b32.xlu1 %v153_v35, %s1799_s28  ;;  %v468_v58 = vld [vmem:[%s2825_s1 + $0xd0] sm:$0xff]  ;;  %v1747_v59 = vpack.c.bf16 %v477_v56, %v476_v55  ;;  %v401_v60 = vld [vmem:[%s2824_s0 + $0x2] sm:$0xff]  ;;  %125 = vst.msk [vmem:[#allocation2 + $0x60] sm:$0xfc] %vm119_vm8, %v2026_v57  ;;  %v1729_v13 = vpack.c.bf16 %v451_v54, %v450_v50  ;;  %v56_v42 = vrot.slane %v1899_v11, 6  ;;  %v159_v48 = vrot.slane %v1899_v11, 7 }
  0x13   :  { %1722 = vmatpush3.bf16.msra.mxu0 %v1721_v40  ;;  %v402_v61 = vld [vmem:[%s2824_s0 + $0xa] sm:$0xff]  ;;  %409 = vst.msk [vmem:[#allocation2 + $0x10] sm:$0xff] %vm70_vm0, %v401_v60  ;;  %v267_v1 = vld [vmem:[%s2824_s0 + $0x18] sm:$0xff]  ;;  %1746 = vmatpush3.bf16.msra.mxu1 %v1743_v51  ;;  %v222_v20 = vsel %vm148_vm4, %v1932_v19, %v221_v63  ;;  %v470_v22 = vld [vmem:[%s2825_s1 + $0xe0] sm:$0xff]  ;;  %v158_v43 = vsel %vm148_vm4, %v156_v25, %v157_v38  ;;  %vm189_vm13 = vcmask 785920   ;;  %vm256_vm14 = vcmask 1048320  }
  0x14   :  { %1724 = vmatprep.subr.bf16.mxu0 %v1723_v45  ;;  %410 = vst.msk [vmem:[#allocation2 + $0x28] sm:$0xff] %vm70_vm0, %v402_v61  ;;  %v32_v2 = vld [vmem:[%s2824_s0 + $0x18] sm:$0x3f]  ;;  %275 = vst.msk [vmem:[#allocation2 + $0x50] sm:$0xff] %vm70_vm0, %v267_v1  ;;  %1748 = vmatprep.subr.bf16.mxu1 %v1747_v59  ;;  %v452_v14 = vld [vmem:[%s2825_s1 + $0x50] sm:$0xff]  ;;  %v160_v50 = vsel %vm148_vm4, %v157_v38, %v159_v48  ;;  %vm187_vm15 = vcmask 785921  }
  0x15   :  { %v84_v3 = vld [vmem:[%s2824_s0 + $0x18] sm:$0x3f]  ;;  %v51_v6 = vrot.slane %v32_v2, 6  ;;  %291 = vst.msk [vmem:[#allocation2 + $0x50] sm:$0xff] %vm121_vm1, %v267_v1  ;;  %v471_v23 = vld [vmem:[%s2825_s1 + $0xe8] sm:$0xff]  ;;  %v454_v24 = vld [vmem:[%s2825_s1 + $0x60] sm:$0xff] }
  0x16   :  { %369 = vrot.lane.b32.xlu0 %v300_v34, %s1799_s28  ;;  %234 = vrot.lane.b32.xlu1 %v153_v35, %s1799_s28  ;;  %v469_v5 = vld [vmem:[%s2825_s1 + $0xd8] sm:$0xff]  ;;  %v102_v9 = vrot.slane %v84_v3, 6  ;;  %296 = vst.msk [vmem:[#allocation2 + $0x57] sm:$0x1] %vm129_vm5, %v1800_v4  ;;  %v455_v26 = vld [vmem:[%s2825_s1 + $0x68] sm:$0xff]  ;;  %v1735_v30 = vpack.c.bf16 %v471_v23, %v470_v22  ;;  %v54_v35 = vrot.slane %v1882_v8, 6 }
  0x17   :  { %v403_v10 = vld [vmem:[%s2824_s0 + $0x12] sm:$0xff]  ;;  %v404_v12 = vld [vmem:[%s2824_s0 + $0x1a] sm:$0x3f]  ;;  %1726 = vmatpush3.bf16.msra.mxu0 %v1725_v53  ;;  %v52_v16 = vsel %vm45_vm9, %v1952_v28, %v51_v6  ;;  %v1731_v21 = vpack.c.bf16 %v469_v5, %v468_v58  ;;  %347 = vst.msk [vmem:[#allocation2 + $0x57] sm:$0x1] %vm197_vm6, %v1800_v4  ;;  %1750 = vmatpush3.bf16.msra.mxu1 %v1747_v59  ;;  %v302_v29 = vld [vmem:[%s2824_s0 + $0x21] sm:$0xff] }
  0x18   :  { %411 = vst.msk [vmem:[#allocation2 + $0x40] sm:$0xff] %vm70_vm0, %v403_v10  ;;  %v453_v15 = vld [vmem:[%s2825_s1 + $0x58] sm:$0xff]  ;;  %v103_v17 = vsel %vm45_vm9, %v1952_v28, %v102_v9  ;;  %1728 = vmatprep.subr.bf16.mxu0 %v1727_v0  ;;  %73 = vst.msk [vmem:[#allocation2 + $0x48] sm:$0xff] %vm70_vm0, %v52_v16  ;;  %v472_v31 = vld [vmem:[%s2825_s1 + $0xf0] sm:$0xff]  ;;  %v1737_v34 = vpack.c.bf16 %v455_v26, %v454_v24  ;;  %v55_v40 = vsel %vm45_vm9, %v2026_v57, %v54_v35  ;;  %vm254_vm2 = vcmask 1048321   ;;  %s1802_s24 = smov 96  }
  0x19   :  { %413 = vst.msk [vmem:[#allocation2 + $0x58] sm:$0x3f] %vm412_vm11, %v404_v12  ;;  %v352_v18 = vld [vmem:[%s2824_s0 + $0x19] sm:$0x7f]  ;;  %v1733_v19 = vpack.c.bf16 %v453_v15, %v452_v14  ;;  %v456_v36 = vld [vmem:[%s2825_s1 + $0x70] sm:$0xff]  ;;  %v57_v44 = vsel %vm45_vm9, %v54_v35, %v56_v42  ;;  %v405_v45 = vld [vmem:[%s2824_s0 + $0x22] sm:$0xff] }
  0x1a   :  { %320 = vrot.lane.b32.xlu0 %v301_v52, %s1799_s28  ;;  %169 = vrot.lane.b32.xlu1 %v155_v62, %s1799_s28  ;;  %124 = vst.msk [vmem:[#allocation2 + $0x48] sm:$0xff] %vm121_vm1, %v103_v17  ;;  %v420_v27 = vld [vmem:[#allocation2 + $0x10] sm:$0xff]  ;;  %v473_v7 = vld [vmem:[%s2825_s1 + $0xf8] sm:$0xff]  ;;  %vm758_vm3 = vcmask 257024   ;;  %vm392_vm7 = vcmask 1047296   ;;  %vm801_vm8 = vcmask 518400  }
  0x1b   :  { %1730 = vmatpush3.bf16.msra.mxu0 %v1729_v13  ;;  %v423_v28 = vld [vmem:[#allocation2 + $0x28] sm:$0xff]  ;;  %1679 = vmatprep.mubr.msk.f32.mxu1 %vm70_vm0, %v420_v27  ;;  %v457_v37 = vld [vmem:[%s2825_s1 + $0x78] sm:$0xff]  ;;  %v1739_v39 = vpack.c.bf16 %v473_v7, %v472_v31  ;;  %75 = vst.msk [vmem:[#allocation2 + $0x78] sm:$0xff] %vm70_vm0, %v55_v40  ;;  %76 = vst.msk [vmem:[#allocation2 + $0x90] sm:$0xff] %vm70_vm0, %v57_v44  ;;  %vm852_vm10 = vcmask 779776  }
  0x1c   :  { %1732 = vmatprep.subr.bf16.mxu0 %v1731_v21  ;;  %1680 = vmatmul.mubr.msk.f32.vlgmr.msra.gmra.mrb[0].mxu1 %vm70_vm0, %v423_v28  ;;  %v1741_v41 = vpack.c.bf16 %v457_v37, %v456_v36  ;;  %126 = vst.msk [vmem:[#allocation2 + $0x78] sm:$0xff] %vm121_vm1, %v55_v40  ;;  %v303_v8 = vld [vmem:[%s2824_s0 + $0x29] sm:$0xff]  ;;  %127 = vst.msk [vmem:[#allocation2 + $0x90] sm:$0xff] %vm121_vm1, %v57_v44  ;;  %v271_v47 = vld [vmem:[%s2824_s0 + $0x38] sm:$0xff] }
  0x1d   :  { %414 = vst.msk [vmem:[#allocation2 + $0x70] sm:$0xff] %vm70_vm0, %v405_v45  ;;  %v406_v46 = vld [vmem:[%s2824_s0 + $0x2a] sm:$0xff]  ;;  %279 = vst.msk [vmem:[#allocation2 + $0xb0] sm:$0xff] %vm70_vm0, %v271_v47  ;;  %v407_v49 = vld [vmem:[%s2824_s0 + $0x32] sm:$0xff] }
  0x1e   :  { %371 = vrot.lane.b32.xlu0 %v352_v18, %s1799_s28  ;;  %236 = vrot.lane.b32.xlu1 %v222_v20, %s1799_s28  ;;  %415 = vst.msk [vmem:[#allocation2 + $0x88] sm:$0xff] %vm70_vm0, %v406_v46  ;;  %v304_v11 = vld [vmem:[%s2824_s0 + $0x31] sm:$0xff]  ;;  %416 = vst.msk [vmem:[#allocation2 + $0xa0] sm:$0xff] %vm70_vm0, %v407_v49  ;;  %v408_v52 = vld [vmem:[%s2824_s0 + $0x3a] sm:$0x3f] }
  0x1f   :  { %v426_v32 = vld [vmem:[#allocation2 + $0x40] sm:$0xff]  ;;  %1734 = vmatpush3.bf16.msra.mxu0 %v1733_v19  ;;  %295 = vst.msk [vmem:[#allocation2 + $0xb0] sm:$0xff] %vm121_vm1, %v271_v47  ;;  %v139_v53 = vld [vmem:[%s2824_s0 + $0x38] sm:$0x7f] }
  0x20   :  { %v429_v33 = vld [vmem:[#allocation2 + $0x58] sm:$0xff]  ;;  %1682 = vmatprep.mubr.msk.f32.mxu1 %vm70_vm0, %v426_v32  ;;  %1736 = vmatprep.subr.bf16.mxu0 %v1735_v30  ;;  %297 = vst.msk [vmem:[#allocation2 + $0xb7] sm:$0x1] %vm129_vm5, %v1800_v4  ;;  %v161_v59 = vrot.slane %v139_v53, 7  ;;  %vm341_vm5 = vcmask 784896  }
  0x21   :  { %1111 = vst.msk [vmem:[#allocation2 + $0x58] sm:$0xf0] %vm792_vm12, %v1800_v4  ;;  %1683 = vmatmul.mubr.msk.f32.gmra.mrb[2].mxu1 %vm70_vm0, %v429_v33  ;;  %v36_v55 = vld [vmem:[%s2824_s0 + $0x38] sm:$0x3f] }
  0x22   :  { %322 = vrot.lane.b32.xlu0 %v302_v29, %s1799_s28  ;;  %171 = vrot.lane.b32.xlu1 %v156_v25, %s1799_s28  ;;  %348 = vst.msk [vmem:[#allocation2 + $0xb7] sm:$0x1] %vm197_vm6, %v1800_v4  ;;  %v88_v56 = vld [vmem:[%s2824_s0 + $0x38] sm:$0x3f]  ;;  %v58_v57 = vrot.slane %v36_v55, 6  ;;  %v162_v1 = vsel %vm148_vm4, %v159_v48, %v161_v59 }
  0x23   :  { %1738 = vmatpush3.bf16.msra.mxu0 %v1737_v34  ;;  %417 = vst.msk [vmem:[#allocation2 + $0xb8] sm:$0x3f] %vm412_vm11, %v408_v52  ;;  %v109_v58 = vrot.slane %v88_v56, 6  ;;  %v207_v60 = vld [vmem:[%s2824_s0 + $0x38] sm:$0x7f]  ;;  %vm961_vm11 = vcmask 1046528  }
  0x24   :  { %1740 = vmatprep.subr.bf16.mxu0 %v1739_v39  ;;  %v432_v51 = vld [vmem:[#allocation2 + $0x70] sm:$0xff]  ;;  %v59_v61 = vsel %vm45_vm9, %v56_v42, %v58_v57  ;;  %v305_v0 = vld [vmem:[%s2824_s0 + $0x39] sm:$0x7f]  ;;  %v228_v2 = vrot.slane %v207_v60, 7  ;;  %v1179_v57 = vld [vmem:[%s2826_s4 + $0x100] sm:$0xff] }
  0x25   :  { %1685 = vmatprep.mubr.msk.f32.mxu1 %vm70_vm0, %v432_v51  ;;  %v435_v54 = vld [vmem:[#allocation2 + $0x88] sm:$0xff]  ;;  %v110_v62 = vsel %vm45_vm9, %v56_v42, %v109_v58  ;;  %77 = vst.msk [vmem:[#allocation2 + $0xa8] sm:$0xff] %vm70_vm0, %v59_v61  ;;  %v438_v63 = vld [vmem:[#allocation2 + $0xa0] sm:$0xff]  ;;  %v356_v5 = vld [vmem:[%s2824_s0 + $0x39] sm:$0x7f] }
  0x26   :  { %373 = vrot.lane.b32.xlu0 %v302_v29, %s1799_s28  ;;  %238 = vrot.lane.b32.xlu1 %v156_v25, %s1799_s28  ;;  %128 = vst.msk [vmem:[#allocation2 + $0xa8] sm:$0xff] %vm121_vm1, %v110_v62  ;;  %v229_v6 = vsel %vm148_vm4, %v159_v48, %v228_v2  ;;  %v1180_v58 = vld [vmem:[%s2826_s4 + $0x108] sm:$0xff]  ;;  %v1181_v62 = vld [vmem:[%s2826_s4 + $0x110] sm:$0xff] }
  0x27   :  { %1742 = vmatpush3.bf16.msra.mxu0 %v1741_v41  ;;  %1686 = vmatmul.mubr.msk.f32.gmra.mrb[4].mxu1 %vm70_vm0, %v435_v54  ;;  %v2262_v59 = vpack.c.bf16 %v1180_v58, %v1179_v57  ;;  %v1157_v57 = vld [vmem:[%s2826_s4 + $0x50] sm:$0xff] }
  0x28   :  { %1688 = vmatprep.mubr.msk.f32.mxu1 %vm70_vm0, %v438_v63  ;;  %v1182_v63 = vld [vmem:[%s2826_s4 + $0x118] sm:$0xff] }
  0x29   :  { %1784 = vmatprep.subr.bf16.mxu0 %v2262_v59 }
  0x2a   :  { %324 = vrot.lane.b32.xlu0 %v303_v8, %s1799_s28  ;;  %173 = vrot.lane.b32.xlu1 %v158_v43, %s1799_s28  ;;  %v441_v3 = vld [vmem:[#allocation2 + $0xb8] sm:$0xff] }
  0x2b   :  { %1689 = vmatmul.mubr.msk.f32.gmra.mrb[6].mxu1 %vm70_vm0, %v441_v3  ;;  %1112 = vst.msk [vmem:[#allocation2 + $0xb8] sm:$0xf0] %vm792_vm12, %v1800_v4 }
  0x2e   :  { %375 = vrot.lane.b32.xlu0 %v303_v8, %s1799_s28  ;;  %240 = vrot.lane.b32.xlu1 %v158_v43, %s1799_s28 }
  0x32   :  { %326 = vrot.lane.b32.xlu0 %v304_v11, %s1799_s28  ;;  %175 = vrot.lane.b32.xlu1 %v160_v50, %s1799_s28 }
  0x36   :  { %377 = vrot.lane.b32.xlu0 %v304_v11, %s1799_s28  ;;  %242 = vrot.lane.b32.xlu1 %v160_v50, %s1799_s28 }
  0x3a   :  { %328 = vrot.lane.b32.xlu0 %v305_v0, %s1799_s28  ;;  %177 = vrot.lane.b32.xlu1 %v162_v1, %s1799_s28  ;;  %v2276_v0 = vpack.c.bf16 %v1182_v63, %v1181_v62  ;;  %v1158_v63 = vld [vmem:[%s2826_s4 + $0x58] sm:$0xff] }
  0x3e   :  { %379 = vrot.lane.b32.xlu0 %v356_v5, %s1799_s28  ;;  %244 = vrot.lane.b32.xlu1 %v229_v6, %s1799_s28  ;;  %v1163_v6 = vld [vmem:[%s2826_s4 + $0x80] sm:$0xff] }
  0x74   :  { %v315_v9 = vpop.permute.xlu0 %314  ;;  %v366_v10 = vpop.permute.xlu1 %365 }
  0x75   :  { %338 = vst.msk [vmem:[#allocation2 + $0x8] sm:$0xff] %vm189_vm13, %v315_v9  ;;  %v1164_v9 = vld [vmem:[%s2826_s4 + $0x88] sm:$0xff] }
  0x76   :  { %389 = vst.msk [vmem:[#allocation2 + $0x8] sm:$0xff] %vm256_vm14, %v366_v10  ;;  %v1751_v10 = vpack.c.bf16 %v1164_v9, %v1163_v6 }
  0x78   :  { %v164_v12 = vpop.permute.xlu0 %163  ;;  %v231_v13 = vpop.permute.xlu1 %230  ;;  %1752 = vmatprep.subr.bf16.mxu1 %v1751_v10 }
  0x79   :  { %188 = vst.msk [vmem:[#allocation2] sm:$0xfe] %vm187_vm15, %v164_v12  ;;  %v1147_v12 = vld [vmem:[%s2826_s4] sm:$0xff] }
  0x7a   :  { %255 = vst.msk [vmem:[#allocation2] sm:$0xfe] %vm254_vm2, %v231_v13  ;;  %v1148_v13 = vld [vmem:[%s2826_s4 + $0x8] sm:$0xff] }
  0x7c   :  { %v317_v14 = vpop.permute.xlu0 %316  ;;  %v166_v15 = vpop.permute.xlu1 %165 }
  0x7d   :  { %339 = vst.msk [vmem:[#allocation2 + $0x20] sm:$0xff] %vm189_vm13, %v317_v14  ;;  %190 = vst.msk [vmem:[#allocation2 + $0x18] sm:$0xff] %vm189_vm13, %v166_v15  ;;  %v419_v16 = vld [vmem:[#allocation2 + $0x8] sm:$0xff]  ;;  %v1165_v14 = vld [vmem:[%s2826_s4 + $0x90] sm:$0xff]  ;;  %v1753_v15 = vpack.c.bf16 %v1148_v13, %v1147_v12  ;;  %v1773_v12 = vpack.c.bf16 %v1158_v63, %v1157_v57 }
  0x7e   :  { %566 = vmatprep.mubr.f32.mxu0 %v419_v16  ;;  %v1166_v16 = vld [vmem:[%s2826_s4 + $0x98] sm:$0xff] }
  0x7f   :  { %1754 = vmatpush3.bf16.msra.mxu1 %v1753_v15  ;;  %v1175_v15 = vld [vmem:[%s2826_s4 + $0xe0] sm:$0xff] }
  0x80   :  { %v368_v17 = vpop.permute.xlu0 %367  ;;  %v233_v18 = vpop.permute.xlu1 %232 }
  0x81   :  { %v418_v20 = vld [vmem:[#allocation2] sm:$0xff]  ;;  %390 = vst.msk [vmem:[#allocation2 + $0x20] sm:$0xff] %vm256_vm14, %v368_v17  ;;  %257 = vst.msk [vmem:[#allocation2 + $0x18] sm:$0xff] %vm256_vm14, %v233_v18  ;;  %v1755_v17 = vpack.c.bf16 %v1166_v16, %v1165_v14  ;;  %v1176_v16 = vld [vmem:[%s2826_s4 + $0xe8] sm:$0xff] }
  0x82   :  { %759 = vst.msk [vmem:[#allocation2] sm:$0xf] %vm758_vm3, %v1800_v4  ;;  %567 = vmatmul.mubr.f32.vlgmr.msra.gmra.mrb[0].mxu0 %v418_v20 }
  0x83   :  { %1786 = vmatpush3.bf16.msra.mxu0 %v2262_v59  ;;  %1756 = vmatprep.subr.bf16.mxu1 %v1755_v17  ;;  %802 = vst.msk [vmem:[#allocation2] sm:$0x7] %vm801_vm8, %v1800_v4 }
  0x84   :  { %v319_v21 = vpop.permute.xlu0 %318  ;;  %v168_v22 = vpop.permute.xlu1 %167  ;;  %1788 = vmatprep.subr.bf16.mxu0 %v2276_v0  ;;  %853 = vst.msk [vmem:[#allocation2] sm:$0x3] %vm852_vm10, %v1800_v4 }
  0x85   :  { %340 = vst.msk [vmem:[#allocation2 + $0x38] sm:$0xff] %vm189_vm13, %v319_v21  ;;  %191 = vst.msk [vmem:[#allocation2 + $0x30] sm:$0xff] %vm189_vm13, %v168_v22  ;;  %v1149_v21 = vld [vmem:[%s2826_s4 + $0x10] sm:$0xff]  ;;  %v1150_v22 = vld [vmem:[%s2826_s4 + $0x18] sm:$0xff] }
  0x86   :  { %902 = vst.msk [vmem:[#allocation2] sm:$0x1] %vm197_vm6, %v1800_v4 }
  0x87   :  { %1790 = vmatpush3.bf16.msra.mxu0 %v2276_v0 }
  0x88   :  { %v370_v23 = vpop.permute.xlu0 %369  ;;  %v235_v19 = vpop.permute.xlu1 %234  ;;  %v422_v24 = vld [vmem:[#allocation2 + $0x20] sm:$0xff]  ;;  %v421_v25 = vld [vmem:[#allocation2 + $0x18] sm:$0xff] }
  0x89   :  { %391 = vst.msk [vmem:[#allocation2 + $0x38] sm:$0xff] %vm256_vm14, %v370_v23  ;;  %258 = vst.msk [vmem:[#allocation2 + $0x30] sm:$0xff] %vm256_vm14, %v235_v19  ;;  %571 = vmatprep.mubr.f32.mxu0 %v422_v24  ;;  %v1757_v19 = vpack.c.bf16 %v1150_v22, %v1149_v21  ;;  %v2315_v24 = vld [vmem:[%s2827_s2] ss:$0 sm:$0xff] }
  0x8a   :  { %572 = vmatmul.mubr.f32.gmra.mrb[2].mxu0 %v421_v25  ;;  %v1167_v25 = vld [vmem:[%s2826_s4 + $0xa0] sm:$0xff] }
  0x8b   :  { %1758 = vmatpush3.bf16.msra.mxu1 %v1757_v19  ;;  %v1159_v19 = vld [vmem:[%s2826_s4 + $0x60] sm:$0xff] }
  0x8c   :  { %v321_v26 = vpop.permute.xlu0 %320  ;;  %v170_v27 = vpop.permute.xlu1 %169 }
  0x8d   :  { %342 = vst.msk [vmem:[#allocation2 + $0x50] sm:$0x7f] %vm341_vm5, %v321_v26  ;;  %v1168_v26 = vld [vmem:[%s2826_s4 + $0xa8] sm:$0xff] }
  0x8e   :  { %192 = vst.msk [vmem:[#allocation2 + $0x48] sm:$0xff] %vm189_vm13, %v170_v27 }
  0x90   :  { %v372_v28 = vpop.permute.xlu0 %371  ;;  %v237_v29 = vpop.permute.xlu1 %236  ;;  %v425_v30 = vld [vmem:[#allocation2 + $0x38] sm:$0xff]  ;;  %v424_v31 = vld [vmem:[#allocation2 + $0x30] sm:$0xff] }
  0x91   :  { %393 = vst.msk [vmem:[#allocation2 + $0x50] sm:$0x7f] %vm392_vm7, %v372_v28  ;;  %576 = vmatprep.mubr.f32.mxu0 %v425_v30  ;;  %v1759_v28 = vpack.c.bf16 %v1168_v26, %v1167_v25  ;;  %v1151_v30 = vld [vmem:[%s2826_s4 + $0x20] sm:$0xff]  ;;  %v1160_v25 = vld [vmem:[%s2826_s4 + $0x68] sm:$0xff] }
  0x92   :  { %259 = vst.msk [vmem:[#allocation2 + $0x48] sm:$0xff] %vm256_vm14, %v237_v29  ;;  %577 = vmatmul.mubr.f32.gmra.mrb[4].mxu0 %v424_v31  ;;  %v2328_v29 = vld [vmem:[%s2828_s3] ss:$0 sm:$0xff]  ;;  %v1152_v31 = vld [vmem:[%s2826_s4 + $0x28] sm:$0xff] }
  0x93   :  { %1760 = vmatprep.subr.bf16.mxu1 %v1759_v28 }
  0x94   :  { %v323_v7 = vpop.permute.xlu0 %322  ;;  %v172_v32 = vpop.permute.xlu1 %171 }
  0x95   :  { %343 = vst.msk [vmem:[#allocation2 + $0x68] sm:$0xff] %vm189_vm13, %v323_v7 }
  0x96   :  { %193 = vst.msk [vmem:[#allocation2 + $0x60] sm:$0xfe] %vm187_vm15, %v172_v32  ;;  %v1761_v32 = vpack.c.bf16 %v1152_v31, %v1151_v30  ;;  %vm804_vm15 = vcmask 1042432  }
  0x98   :  { %v428_v33 = vld [vmem:[#allocation2 + $0x50] sm:$0xff]  ;;  %v374_v35 = vpop.permute.xlu0 %373  ;;  %v239_v36 = vpop.permute.xlu1 %238  ;;  %1762 = vmatpush3.bf16.msra.mxu1 %v1761_v32 }
  0x99   :  { %v427_v34 = vld [vmem:[#allocation2 + $0x48] sm:$0xff]  ;;  %581 = vmatprep.mubr.f32.mxu0 %v428_v33  ;;  %394 = vst.msk [vmem:[#allocation2 + $0x68] sm:$0xff] %vm256_vm14, %v374_v35  ;;  %v1169_v33 = vld [vmem:[%s2826_s4 + $0xb0] sm:$0xff] }
  0x9a   :  { %260 = vst.msk [vmem:[#allocation2 + $0x60] sm:$0xfe] %vm254_vm2, %v239_v36  ;;  %582 = vmatmul.mubr.f32.gmra.mrb[6].mxu0 %v427_v34  ;;  %v1170_v34 = vld [vmem:[%s2826_s4 + $0xb8] sm:$0xff]  ;;  %v1153_v35 = vld [vmem:[%s2826_s4 + $0x30] sm:$0xff] }
  0x9b   :  { %v1177_v32 = vld [vmem:[%s2826_s4 + $0xf0] sm:$0xff] }
  0x9c   :  { %v325_v37 = vpop.permute.xlu0 %324  ;;  %v174_v38 = vpop.permute.xlu1 %173 }
  0x9d   :  { %344 = vst.msk [vmem:[#allocation2 + $0x80] sm:$0xff] %vm189_vm13, %v325_v37  ;;  %194 = vst.msk [vmem:[#allocation2 + $0x78] sm:$0xff] %vm189_vm13, %v174_v38  ;;  %v1763_v38 = vpack.c.bf16 %v1170_v34, %v1169_v33  ;;  %v1178_v33 = vld [vmem:[%s2826_s4 + $0xf8] sm:$0xff] }
  0x9f   :  { %1764 = vmatprep.subr.bf16.mxu1 %v1763_v38  ;;  %v1777_v38 = vpack.c.bf16 %v1160_v25, %v1159_v19 }
  0xa0   :  { %v376_v40 = vpop.permute.xlu0 %375  ;;  %v241_v41 = vpop.permute.xlu1 %240  ;;  %v431_v42 = vld [vmem:[#allocation2 + $0x68] sm:$0xff] }
  0xa1   :  { %v430_v39 = vld [vmem:[#allocation2 + $0x60] sm:$0xff]  ;;  %395 = vst.msk [vmem:[#allocation2 + $0x80] sm:$0xff] %vm256_vm14, %v376_v40  ;;  %261 = vst.msk [vmem:[#allocation2 + $0x78] sm:$0xff] %vm256_vm14, %v241_v41  ;;  %586 = vmatprep.mubr.f32.mxu0 %v431_v42 }
  0xa2   :  { %760 = vst.msk [vmem:[#allocation2 + $0x60] sm:$0xf] %vm758_vm3, %v1800_v4  ;;  %587 = vmatmul.mubr.f32.gmra.mrb[8].mxu0 %v430_v39  ;;  %v1154_v39 = vld [vmem:[%s2826_s4 + $0x38] sm:$0xff] }
  0xa3   :  { %803 = vst.msk [vmem:[#allocation2 + $0x60] sm:$0x7] %vm801_vm8, %v1800_v4  ;;  %v1765_v41 = vpack.c.bf16 %v1154_v39, %v1153_v35  ;;  %v1779_v39 = vpack.c.bf16 %v1178_v33, %v1177_v32  ;;  %vm958_vm8 = vcmask 516352  }
  0xa4   :  { %v327_v8 = vpop.permute.xlu0 %326  ;;  %v176_v43 = vpop.permute.xlu1 %175  ;;  %854 = vst.msk [vmem:[#allocation2 + $0x60] sm:$0x3] %vm852_vm10, %v1800_v4  ;;  %vm1054_vm10 = vcmask 783872  }
  0xa5   :  { %345 = vst.msk [vmem:[#allocation2 + $0x98] sm:$0xff] %vm189_vm13, %v327_v8  ;;  %195 = vst.msk [vmem:[#allocation2 + $0x90] sm:$0xff] %vm189_vm13, %v176_v43  ;;  %1766 = vmatpush3.bf16.msra.mxu1 %v1765_v41 }
  0xa6   :  { %903 = vst.msk [vmem:[#allocation2 + $0x60] sm:$0x1] %vm197_vm6, %v1800_v4  ;;  %vm769_vm6 = vcmask 1043456  }
  0xa8   :  { %v378_v44 = vpop.permute.xlu0 %377  ;;  %v243_v45 = vpop.permute.xlu1 %242  ;;  %v434_v46 = vld [vmem:[#allocation2 + $0x80] sm:$0xff]  ;;  %v433_v47 = vld [vmem:[#allocation2 + $0x78] sm:$0xff] }
  0xa9   :  { %396 = vst.msk [vmem:[#allocation2 + $0x98] sm:$0xff] %vm256_vm14, %v378_v44  ;;  %262 = vst.msk [vmem:[#allocation2 + $0x90] sm:$0xff] %vm256_vm14, %v243_v45  ;;  %591 = vmatprep.mubr.f32.mxu0 %v434_v46  ;;  %v1171_v45 = vld [vmem:[%s2826_s4 + $0xc0] sm:$0xff]  ;;  %v1172_v46 = vld [vmem:[%s2826_s4 + $0xc8] sm:$0xff] }
  0xaa   :  { %592 = vmatmul.mubr.f32.gmra.mrb[10].mxu0 %v433_v47  ;;  %v1767_v47 = vpack.c.bf16 %v1172_v46, %v1171_v45 }
  0xac   :  { %v329_v48 = vpop.permute.xlu0 %328  ;;  %v178_v49 = vpop.permute.xlu1 %177  ;;  %1768 = vmatprep.subr.bf16.mxu1 %v1767_v47 }
  0xad   :  { %346 = vst.msk [vmem:[#allocation2 + $0xb0] sm:$0x7f] %vm341_vm5, %v329_v48  ;;  %v1155_v48 = vld [vmem:[%s2826_s4 + $0x40] sm:$0xff]  ;;  %vm1012_vm5 = vcmask 1045504  }
  0xae   :  { %196 = vst.msk [vmem:[#allocation2 + $0xa8] sm:$0xff] %vm189_vm13, %v178_v49  ;;  %v1156_v49 = vld [vmem:[%s2826_s4 + $0x48] sm:$0xff] }
  0xb0   :  { %v437_v11 = vld [vmem:[#allocation2 + $0x98] sm:$0xff]  ;;  %v436_v50 = vld [vmem:[#allocation2 + $0x90] sm:$0xff]  ;;  %v380_v51 = vpop.permute.xlu0 %379  ;;  %v245_v52 = vpop.permute.xlu1 %244 }
  0xb1   :  { %596 = vmatprep.mubr.f32.mxu0 %v437_v11  ;;  %397 = vst.msk [vmem:[#allocation2 + $0xb0] sm:$0x7f] %vm392_vm7, %v380_v51  ;;  %vm1063_vm7 = vcmask 1044480  }
  0xb2   :  { %263 = vst.msk [vmem:[#allocation2 + $0xa8] sm:$0xff] %vm256_vm14, %v245_v52  ;;  %597 = vmatmul.mubr.f32.gmra.mrb[12].mxu0 %v436_v50 }
  0xb8   :  { %v440_v53 = vld [vmem:[#allocation2 + $0xb0] sm:$0xff] }
  0xb9   :  { %v439_v54 = vld [vmem:[#allocation2 + $0xa8] sm:$0xff]  ;;  %601 = vmatprep.mubr.f32.mxu0 %v440_v53 }
  0xba   :  { %602 = vmatmul.mubr.f32.gmra.mrb[14].mxu0 %v439_v54  ;;  %v1769_v54 = vpack.c.bf16 %v1156_v49, %v1155_v48 }
  0xbc   :  { %1770 = vmatpush3.bf16.msra.mxu1 %v1769_v54 }
  0xef   :  { %v2254_v55 = vpop.f32.mrb[0].mxu1 }
  0xf0   :  { %v673_v56 = vpop.f32.mrb[1].mxu1 }
  0xf4   :  { %v2264_v60 = vpop.f32.mrb[2].mxu1 }
  0xf5   :  { %v2267_v61 = vpop.f32.mrb[3].mxu1 }
  0xfa   :  { %v2280_v1 = vpop.f32.mrb[4].mxu1 }
  0xfb   :  { %v2282_v2 = vpop.f32.mrb[5].mxu1 }
  0xfe   :  { %v2284_v3 = vpop.f32.mrb[6].mxu1 }
  0xff   :  { %v2286_v5 = vpop.f32.mrb[7].mxu1 }
 0x155   :  { %v1567_v18 = vpop.f32.mrb[0].mxu0 }
 0x156   :  { %v1568_v20 = vpop.f32.mrb[1].mxu0 }
 0x157   :  { %v1569_v23 = vadd.f32 %v1568_v20, %v1567_v18  ;;  %v1775_v18 = vpack.c.bf16 %v1176_v16, %v1175_v15 }
 0x159   :  { %v2323_v27 = vadd.f32 %v1569_v23, %v673_v56  ;;  %v1174_v56 = vld [vmem:[%s2826_s4 + $0xd8] sm:$0xff] }
 0x15b   :  { %v719_v7 = vmul.f32 %v2315_v24, %v2323_v27 }
 0x15d   :  { %v734_v36 = vadd.f32 %v2328_v29, %v719_v7  ;;  %v1570_v37 = vpop.f32.mrb[2].mxu0 }
 0x15e   :  { %v1571_v40 = vpop.f32.mrb[3].mxu0 }
 0x15f   :  { %v742_v42 = vmul.f32 0.01, %v734_v36  ;;  %v1572_v8 = vadd.f32 %v1571_v40, %v1570_v37 }
 0x161   :  { %v2359_v43 = vmax.f32 %v734_v36, %v742_v42  ;;  %v2362_v44 = vadd.f32 %v2254_v55, %v1572_v8  ;;  %v1173_v55 = vld [vmem:[%s2826_s4 + $0xd0] sm:$0xff]  ;;  %v1162_v8 = vld [vmem:[%s2826_s4 + $0x78] sm:$0xff] }
 0x162   :  { %v1771_v62 = vpack.c.bf16 %v1174_v56, %v1173_v55  ;;  %v1161_v42 = vld [vmem:[%s2826_s4 + $0x70] sm:$0xff] }
 0x163   :  { %v770_v11 = vrot.slane %v2359_v43, 4  ;;  %950 = vst.msk [vmem:[#allocation2 + $0x8] sm:$0xff] %vm70_vm0, %v2359_v43  ;;  %v720_v50 = vmul.f32 %v2315_v24, %v2362_v44  ;;  %v805_v51 = vrot.slane %v2359_v43, 5  ;;  %v855_v10 = vrot.slane %v2359_v43, 6 }
 0x164   :  { %1772 = vmatprep.subr.bf16.mxu1 %v1771_v62  ;;  %v904_v17 = vrot.slane %v2359_v43, 7  ;;  %v962_v21 = vrot.slane %v2359_v43, 1  ;;  %v1013_v35 = vrot.slane %v2359_v43, 2 }
 0x165   :  { %793 = vst.msk [vmem:[#allocation2] sm:$0xf0] %vm792_vm12, %v770_v11  ;;  %v735_v52 = vadd.f32 %v2328_v29, %v720_v50  ;;  %819 = vrot.lane.b32.xlu1 %v805_v51, %s1801_s9  ;;  %v1573_v53 = vpop.f32.mrb[4].mxu0  ;;  %1774 = vmatpush3.bf16.msra.mxu1 %v1773_v12  ;;  %v1781_v50 = vpack.c.bf16 %v1162_v8, %v1161_v42 }
 0x166   :  { %v1574_v58 = vpop.f32.mrb[5].mxu0  ;;  %1776 = vmatprep.subr.bf16.mxu1 %v1775_v18 }
 0x167   :  { %v743_v6 = vmul.f32 0.01, %v735_v52  ;;  %v1575_v9 = vadd.f32 %v1574_v58, %v1573_v53 }
 0x169   :  { %v2398_v13 = vmax.f32 %v735_v52, %v743_v6  ;;  %v2401_v14 = vadd.f32 %v1575_v9, %v2267_v61  ;;  %869 = vrot.lane.b32.xlu1 %v855_v10, %s1799_s28  ;;  %1778 = vmatpush3.bf16.msra.mxu1 %v1777_v38 }
 0x16a   :  { %1780 = vmatprep.subr.bf16.mxu1 %v1779_v39 }
 0x16b   :  { %v771_v20 = vrot.slane %v2398_v13, 4  ;;  %951 = vst.msk [vmem:[#allocation2 + $0x20] sm:$0xff] %vm70_vm0, %v2398_v13  ;;  %v721_v61 = vmul.f32 %v2315_v24, %v2401_v14  ;;  %v963_v22 = vrot.slane %v2398_v13, 1  ;;  %v806_v23 = vrot.slane %v2398_v13, 5 }
 0x16c   :  { %v1014_v31 = vrot.slane %v2398_v13, 2  ;;  %v856_v41 = vrot.slane %v2398_v13, 6  ;;  %v1065_v48 = vrot.slane %v2398_v13, 3  ;;  %v905_v52 = vrot.slane %v2398_v13, 7 }
 0x16d   :  { %v736_v26 = vadd.f32 %v2328_v29, %v721_v61  ;;  %918 = vrot.lane.b32.xlu1 %v904_v17, %s1802_s24  ;;  %v1576_v28 = vpop.f32.mrb[6].mxu0  ;;  %v964_v30 = vsel %vm961_vm11, %v962_v21, %v963_v22  ;;  %v772_v7 = vsel %vm769_vm6, %v770_v11, %v771_v20  ;;  %v807_v40 = vsel %vm804_vm15, %v805_v51, %v806_v23 }
 0x16e   :  { %v1577_v34 = vpop.f32.mrb[7].mxu0  ;;  %976 = vrot.lane.b32.xlu0 %v964_v30, %s1801_s9  ;;  %1115 = vst.msk [vmem:[#allocation2 + $0x10] sm:$0xff] %vm70_vm0, %v772_v7  ;;  %794 = vst.msk [vmem:[#allocation2 + $0x18] sm:$0xff] %vm70_vm0, %v772_v7  ;;  %v1015_v47 = vsel %vm1012_vm5, %v1013_v35, %v1014_v31  ;;  %v1064_v11 = vrot.slane %v2359_v43, 3  ;;  %v857_v51 = vsel %vm45_vm9, %v855_v10, %v856_v41  ;;  %1782 = vmatpush3.bf16.msra.mxu1 %v1781_v50 }
 0x16f   :  { %v744_v36 = vmul.f32 0.01, %v736_v26  ;;  %v1578_v37 = vadd.f32 %v1577_v34, %v1576_v28  ;;  %v906_v9 = vsel %vm148_vm4, %v904_v17, %v905_v52  ;;  %1791 = vmatprep.subr.bf16.mxu1 %v2262_v59 }
 0x170   :  { %v1066_v55 = vsel %vm1063_vm7, %v1064_v11, %v1065_v48 }
 0x171   :  { %v2454_v45 = vmax.f32 %v736_v26, %v744_v36  ;;  %v2457_v46 = vadd.f32 %v2264_v60, %v1578_v37  ;;  %821 = vrot.lane.b32.xlu1 %v807_v40, %s1801_s9 }
 0x172   :  { %1027 = vrot.lane.b32.xlu0 %v1015_v47, %s1799_s28 }
 0x173   :  { %v773_v49 = vrot.slane %v2454_v45, 4  ;;  %952 = vst.msk [vmem:[#allocation2 + $0x38] sm:$0xff] %vm70_vm0, %v2454_v45  ;;  %v722_v60 = vmul.f32 %v2315_v24, %v2457_v46  ;;  %v965_v57 = vrot.slane %v2454_v45, 1  ;;  %v808_v10 = vrot.slane %v2454_v45, 5 }
 0x174   :  { %v1016_v12 = vrot.slane %v2454_v45, 2  ;;  %v858_v61 = vrot.slane %v2454_v45, 6  ;;  %v1067_v19 = vrot.slane %v2454_v45, 3  ;;  %v907_v7 = vrot.slane %v2454_v45, 7 }
 0x175   :  { %v774_v53 = vsel %vm769_vm6, %v771_v20, %v773_v49  ;;  %v737_v54 = vadd.f32 %v2328_v29, %v722_v60  ;;  %871 = vrot.lane.b32.xlu1 %v857_v51, %s1799_s28  ;;  %v1125_v56 = vld [vmem:[#allocation2 + $0x10] sm:$0xff]  ;;  %v1579_v58 = vpop.f32.mrb[8].mxu0  ;;  %v966_v16 = vsel %vm961_vm11, %v963_v22, %v965_v57  ;;  %v809_v20 = vsel %vm804_vm15, %v806_v23, %v808_v10 }
 0x176   :  { %795 = vst.msk [vmem:[#allocation2 + $0x30] sm:$0xff] %vm70_vm0, %v774_v53  ;;  %1116 = vst.msk [vmem:[#allocation2 + $0x28] sm:$0xff] %vm70_vm0, %v774_v53  ;;  %1078 = vrot.lane.b32.xlu0 %v1066_v55, %s1802_s24  ;;  %1699 = vmatprep.mubr.msk.f32.mxu0 %vm70_vm0, %v1125_v56  ;;  %v1580_v62 = vpop.f32.mrb[9].mxu0  ;;  %v1068_v32 = vsel %vm1063_vm7, %v1065_v48, %v1067_v19  ;;  %v908_v36 = vsel %vm148_vm4, %v905_v52, %v907_v7 }
 0x177   :  { %v745_v63 = vmul.f32 0.01, %v737_v54  ;;  %v1581_v6 = vadd.f32 %v1580_v62, %v1579_v58 }
 0x179   :  { %v2490_v15 = vmax.f32 %v737_v54, %v745_v63  ;;  %920 = vrot.lane.b32.xlu1 %v906_v9, %s1802_s24  ;;  %v2499_v43 = vadd.f32 %v1581_v6, %v2282_v2  ;;  %v1017_v2 = vsel %vm1012_vm5, %v1014_v31, %v1016_v12  ;;  %v859_v31 = vsel %vm45_vm9, %v856_v41, %v858_v61 }
 0x17a   :  { %978 = vrot.lane.b32.xlu0 %v966_v16, %s1801_s9 }
 0x17b   :  { %v775_v17 = vrot.slane %v2490_v15, 4  ;;  %953 = vst.msk [vmem:[#allocation2 + $0x50] sm:$0xff] %vm70_vm0, %v2490_v15  ;;  %v723_v18 = vmul.f32 %v2315_v24, %v2499_v43  ;;  %v967_v37 = vrot.slane %v2490_v15, 1  ;;  %v810_v38 = vrot.slane %v2490_v15, 5 }
 0x17c   :  { %959 = vst.msk [vmem:[#allocation2 + $0x57] sm:$0x1] %vm958_vm8, %v1800_v4  ;;  %v860_v60 = vrot.slane %v2490_v15, 6  ;;  %v1069_v54 = vrot.slane %v2490_v15, 3  ;;  %v909_v55 = vrot.slane %v2490_v15, 7 }
 0x17d   :  { %1118 = vst.msk [vmem:[#allocation2 + $0x58] sm:$0xf] %vm758_vm3, %v775_v17  ;;  %823 = vrot.lane.b32.xlu1 %v809_v20, %s1801_s9  ;;  %v1128_v21 = vld [vmem:[#allocation2 + $0x28] sm:$0xff]  ;;  %v1582_v22 = vpop.f32.mrb[10].mxu0  ;;  %v738_v23 = vadd.f32 %v2328_v29, %v723_v18  ;;  %v776_v25 = vsel %vm769_vm6, %v773_v49, %v775_v17  ;;  %v811_v48 = vsel %vm804_vm15, %v808_v10, %v810_v38  ;;  %v1018_v49 = vrot.slane %v2490_v15, 2 }
 0x17e   :  { %1029 = vrot.lane.b32.xlu0 %v1017_v2, %s1799_s28  ;;  %1700 = vmatmul.mubr.msk.f32.vlgmr.msra.gmra.mrb[16].mxu0 %vm70_vm0, %v1128_v21  ;;  %v1583_v26 = vpop.f32.mrb[11].mxu0  ;;  %1117 = vst.msk [vmem:[#allocation2 + $0x40] sm:$0xff] %vm70_vm0, %v776_v25  ;;  %796 = vst.msk [vmem:[#allocation2 + $0x48] sm:$0xff] %vm70_vm0, %v776_v25  ;;  %v861_v53 = vsel %vm45_vm9, %v858_v61, %v860_v60  ;;  %v910_v9 = vsel %vm148_vm4, %v907_v7, %v909_v55 }
 0x17f   :  { %v1584_v28 = vadd.f32 %v1583_v26, %v1582_v22  ;;  %v746_v30 = vmul.f32 0.01, %v738_v23  ;;  %v968_v15 = vsel %vm961_vm11, %v965_v57, %v967_v37  ;;  %v1019_v57 = vsel %vm1012_vm5, %v1016_v12, %v1018_v49 }
 0x180   :  { %v1070_v12 = vsel %vm1063_vm7, %v1067_v19, %v1069_v54 }
 0x181   :  { %873 = vrot.lane.b32.xlu1 %v859_v31, %s1799_s28  ;;  %v2536_v33 = vadd.f32 %v2280_v1, %v1584_v28  ;;  %v2538_v34 = vmax.f32 %v738_v23, %v746_v30 }
 0x182   :  { %1080 = vrot.lane.b32.xlu0 %v1068_v32, %s1802_s24 }
 0x183   :  { %v724_v13 = vmul.f32 %v2315_v24, %v2536_v33  ;;  %v777_v35 = vrot.slane %v2538_v34, 4  ;;  %954 = vst.msk [vmem:[#allocation2 + $0x68] sm:$0xff] %vm70_vm0, %v2538_v34  ;;  %v812_v18 = vrot.slane %v2538_v34, 5  ;;  %v862_v21 = vrot.slane %v2538_v34, 6 }
 0x184   :  { %v1134_v41 = vld [vmem:[#allocation2 + $0x58] sm:$0xff]  ;;  %v969_v23 = vrot.slane %v2538_v34, 1  ;;  %v1020_v28 = vrot.slane %v2538_v34, 2  ;;  %v1071_v60 = vrot.slane %v2538_v34, 3 }
 0x185   :  { %v739_v1 = vadd.f32 %v2328_v29, %v724_v13  ;;  %797 = vst.msk [vmem:[#allocation2 + $0x60] sm:$0xf0] %vm792_vm12, %v777_v35  ;;  %922 = vrot.lane.b32.xlu1 %v908_v36, %s1802_s24  ;;  %v1131_v39 = vld [vmem:[#allocation2 + $0x40] sm:$0xff]  ;;  %v1585_v40 = vpop.f32.mrb[12].mxu0  ;;  %vm1003_vm12 = vcmask 522496  }
 0x186   :  { %982 = vrot.lane.b32.xlu0 %v967_v37, %s1801_s9  ;;  %1702 = vmatprep.mubr.msk.f32.mxu0 %vm70_vm0, %v1131_v39  ;;  %v1586_v42 = vpop.f32.mrb[13].mxu0 }
 0x187   :  { %v747_v8 = vmul.f32 0.01, %v739_v1  ;;  %1703 = vmatmul.mubr.msk.f32.gmra.mrb[18].mxu0 %vm70_vm0, %v1134_v41  ;;  %v1587_v47 = vadd.f32 %v1586_v42, %v1585_v40 }
 0x189   :  { %v2558_v11 = vmax.f32 %v739_v1, %v747_v8  ;;  %825 = vrot.lane.b32.xlu1 %v811_v48, %s1801_s9  ;;  %v2562_v50 = vadd.f32 %v1587_v47, %v2286_v5 }
 0x18a   :  { %1033 = vrot.lane.b32.xlu0 %v1018_v49, %s1799_s28 }
 0x18b   :  { %v778_v51 = vrot.slane %v2558_v11, 4  ;;  %955 = vst.msk [vmem:[#allocation2 + $0x80] sm:$0xff] %vm70_vm0, %v2558_v11  ;;  %v725_v52 = vmul.f32 %v2315_v24, %v2562_v50  ;;  %v970_v25 = vrot.slane %v2558_v11, 1  ;;  %v813_v26 = vrot.slane %v2558_v11, 5 }
 0x18c   :  { %v1021_v13 = vrot.slane %v2558_v11, 2  ;;  %v863_v48 = vrot.slane %v2558_v11, 6 }
 0x18d   :  { %v740_v56 = vadd.f32 %v2328_v29, %v725_v52  ;;  %875 = vrot.lane.b32.xlu1 %v861_v53, %s1799_s28  ;;  %v1588_v5 = vpop.f32.mrb[14].mxu0  ;;  %v779_v58 = vsel %vm769_vm6, %v777_v35, %v778_v51  ;;  %v971_v38 = vsel %vm961_vm11, %v969_v23, %v970_v25  ;;  %v814_v47 = vsel %vm804_vm15, %v812_v18, %v813_v26 }
 0x18e   :  { %1084 = vrot.lane.b32.xlu0 %v1069_v54, %s1802_s24  ;;  %v1589_v62 = vpop.f32.mrb[15].mxu0  ;;  %1119 = vst.msk [vmem:[#allocation2 + $0x70] sm:$0xff] %vm70_vm0, %v779_v58  ;;  %798 = vst.msk [vmem:[#allocation2 + $0x78] sm:$0xff] %vm70_vm0, %v779_v58  ;;  %v1022_v49 = vsel %vm1012_vm5, %v1020_v28, %v1021_v13  ;;  %v864_v52 = vsel %vm45_vm9, %v862_v21, %v863_v48  ;;  %v912_v53 = vrot.slane %v2558_v11, 7 }
 0x18f   :  { %v748_v63 = vmul.f32 0.01, %v740_v56  ;;  %v1590_v6 = vadd.f32 %v1589_v62, %v1588_v5 }
 0x191   :  { %v2580_v10 = vmax.f32 %v740_v56, %v748_v63  ;;  %924 = vrot.lane.b32.xlu1 %v910_v9, %s1802_s24  ;;  %v2587_v16 = vadd.f32 %v2284_v3, %v1590_v6 }
 0x192   :  { %980 = vrot.lane.b32.xlu0 %v968_v15, %s1801_s9 }
 0x193   :  { %v780_v17 = vrot.slane %v2580_v10, 4  ;;  %956 = vst.msk [vmem:[#allocation2 + $0x98] sm:$0xff] %vm70_vm0, %v2580_v10  ;;  %v726_v20 = vmul.f32 %v2315_v24, %v2587_v16  ;;  %v972_v45 = vrot.slane %v2580_v10, 1  ;;  %v815_v19 = vrot.slane %v2580_v10, 5 }
 0x194   :  { %v1023_v30 = vrot.slane %v2580_v10, 2  ;;  %v1074_v35 = vrot.slane %v2580_v10, 3  ;;  %v865_v5 = vrot.slane %v2580_v10, 6  ;;  %v914_v62 = vrot.slane %v2580_v10, 7 }
 0x195   :  { %827 = vrot.lane.b32.xlu1 %v812_v18, %s1801_s9  ;;  %v741_v3 = vadd.f32 %v2328_v29, %v726_v20  ;;  %v1137_v61 = vld [vmem:[#allocation2 + $0x70] sm:$0xff]  ;;  %v781_v2 = vsel %vm769_vm6, %v778_v51, %v780_v17  ;;  %v911_v29 = vrot.slane %v2538_v34, 7  ;;  %v1072_v51 = vrot.slane %v2558_v11, 3 }
 0x196   :  { %1031 = vrot.lane.b32.xlu0 %v1019_v57, %s1799_s28  ;;  %1705 = vmatprep.mubr.msk.f32.mxu0 %vm70_vm0, %v1137_v61  ;;  %1120 = vst.msk [vmem:[#allocation2 + $0x88] sm:$0xff] %vm70_vm0, %v781_v2  ;;  %799 = vst.msk [vmem:[#allocation2 + $0x90] sm:$0xff] %vm70_vm0, %v781_v2  ;;  %v973_v34 = vsel %vm961_vm11, %v970_v25, %v972_v45  ;;  %v816_v56 = vsel %vm804_vm15, %v813_v26, %v815_v19 }
 0x197   :  { %v749_v24 = vmul.f32 0.01, %v741_v3  ;;  %v1073_v54 = vsel %vm1063_vm7, %v1071_v60, %v1072_v51  ;;  %v913_v55 = vsel %vm148_vm4, %v911_v29, %v912_v53  ;;  %v1024_v11 = vsel %vm1012_vm5, %v1021_v13, %v1023_v30 }
 0x198   :  { %v866_v58 = vsel %vm45_vm9, %v863_v48, %v865_v5  ;;  %v1075_v63 = vsel %vm1063_vm7, %v1072_v51, %v1074_v35  ;;  %v915_v6 = vsel %vm148_vm4, %v912_v53, %v914_v62 }
 0x199   :  { %v2610_v22 = vmax.f32 %v741_v3, %v749_v24  ;;  %877 = vrot.lane.b32.xlu1 %v862_v21, %s1799_s28 }
 0x19a   :  { %1082 = vrot.lane.b32.xlu0 %v1070_v12, %s1802_s24 }
 0x19b   :  { %957 = vst.msk [vmem:[#allocation2 + $0xb0] sm:$0xff] %vm70_vm0, %v2610_v22  ;;  %v974_v31 = vrot.slane %v2610_v22, 1  ;;  %v817_v7 = vrot.slane %v2610_v22, 5  ;;  %v1025_v32 = vrot.slane %v2610_v22, 2  ;;  %v1076_v36 = vrot.slane %v2610_v22, 3 }
 0x19c   :  { %960 = vst.msk [vmem:[#allocation2 + $0xb7] sm:$0x1] %vm958_vm8, %v1800_v4  ;;  %v782_v37 = vrot.slane %v2610_v22, 4  ;;  %v867_v9 = vrot.slane %v2610_v22, 6  ;;  %v916_v15 = vrot.slane %v2610_v22, 7 }
 0x19d   :  { %926 = vrot.lane.b32.xlu1 %v911_v29, %s1802_s24  ;;  %v1140_v1 = vld [vmem:[#allocation2 + $0x88] sm:$0xff]  ;;  %v818_v39 = vsel %vm804_vm15, %v815_v19, %v817_v7  ;;  %v975_v40 = vsel %vm961_vm11, %v972_v45, %v974_v31  ;;  %v1026_v41 = vsel %vm1012_vm5, %v1023_v30, %v1025_v32  ;;  %v1077_v42 = vsel %vm1063_vm7, %v1074_v35, %v1076_v36 }
 0x19e   :  { %984 = vrot.lane.b32.xlu0 %v971_v38, %s1801_s9  ;;  %1706 = vmatmul.mubr.msk.f32.gmra.mrb[20].mxu0 %vm70_vm0, %v1140_v1  ;;  %v783_v8 = vsel %vm769_vm6, %v780_v17, %v782_v37  ;;  %1122 = vst.msk [vmem:[#allocation2 + $0xb8] sm:$0xf] %vm758_vm3, %v782_v37  ;;  %v868_v10 = vsel %vm45_vm9, %v865_v5, %v867_v9  ;;  %vm893_vm9 = vcmask 785922   ;;  %vm1009_vm3 = vcmask 785926  }
 0x19f   :  { %800 = vst.msk [vmem:[#allocation2 + $0xa8] sm:$0xff] %vm70_vm0, %v783_v8  ;;  %1121 = vst.msk [vmem:[#allocation2 + $0xa0] sm:$0xff] %vm70_vm0, %v783_v8  ;;  %v917_v17 = vsel %vm148_vm4, %v914_v62, %v916_v15  ;;  %vm843_vm4 = vcmask 523523   ;;  %vm1060_vm6 = vcmask 1048325   ;;  %vm1105_vm11 = vcmask 1045248  }
 0x1a1   :  { %829 = vrot.lane.b32.xlu1 %v814_v47, %s1801_s9 }
 0x1a2   :  { %1035 = vrot.lane.b32.xlu0 %v1022_v49, %s1799_s28 }
 0x1a5   :  { %879 = vrot.lane.b32.xlu1 %v864_v52, %s1799_s28 }
 0x1a6   :  { %1086 = vrot.lane.b32.xlu0 %v1073_v54, %s1802_s24 }
 0x1a9   :  { %928 = vrot.lane.b32.xlu1 %v913_v55, %s1802_s24 }
 0x1aa   :  { %986 = vrot.lane.b32.xlu0 %v973_v34, %s1801_s9 }
 0x1ad   :  { %831 = vrot.lane.b32.xlu1 %v816_v56, %s1801_s9 }
 0x1ae   :  { %1037 = vrot.lane.b32.xlu0 %v1024_v11, %s1799_s28 }
 0x1b1   :  { %881 = vrot.lane.b32.xlu1 %v866_v58, %s1799_s28 }
 0x1b2   :  { %1088 = vrot.lane.b32.xlu0 %v1075_v63, %s1802_s24 }
 0x1b5   :  { %930 = vrot.lane.b32.xlu1 %v915_v6, %s1802_s24 }
 0x1b6   :  { %990 = vrot.lane.b32.xlu0 %v974_v31, %s1801_s9 }
 0x1b9   :  { %833 = vrot.lane.b32.xlu1 %v818_v39, %s1801_s9 }
 0x1ba   :  { %1041 = vrot.lane.b32.xlu0 %v1025_v32, %s1799_s28 }
 0x1bd   :  { %883 = vrot.lane.b32.xlu1 %v868_v10, %s1799_s28 }
 0x1be   :  { %988 = vrot.lane.b32.xlu0 %v975_v40, %s1801_s9 }
 0x1c1   :  { %932 = vrot.lane.b32.xlu1 %v917_v17, %s1802_s24 }
 0x1c2   :  { %1039 = vrot.lane.b32.xlu0 %v1026_v41, %s1799_s28 }
 0x1c5   :  { %1473 = vrot.lane.b32.xlu1 %v2362_v44, %s1802_s24 }
 0x1c6   :  { %1090 = vrot.lane.b32.xlu0 %v1077_v42, %s1802_s24 }
 0x1c9   :  { %1477 = vrot.lane.b32.xlu1 %v2457_v46, %s1802_s24 }
 0x1ca   :  { %1092 = vrot.lane.b32.xlu0 %v1076_v36, %s1802_s24 }
 0x1cd   :  { %1481 = vrot.lane.b32.xlu1 %v2536_v33, %s1802_s24 }
 0x1ce   :  { %1471 = vrot.lane.b32.xlu0 %v2323_v27, %s1802_s24 }
 0x1d1   :  { %1485 = vrot.lane.b32.xlu1 %v2587_v16, %s1802_s24 }
 0x1d2   :  { %1475 = vrot.lane.b32.xlu0 %v2401_v14, %s1802_s24 }
 0x1d6   :  { %1479 = vrot.lane.b32.xlu0 %v2499_v43, %s1802_s24 }
 0x1d7   :  { %v820_v44 = vpop.permute.xlu1 %819 }
 0x1d8   :  { %844 = vst.msk [vmem:[#allocation2] sm:$0xf8] %vm843_vm4, %v820_v44  ;;  %v1143_v44 = vld [vmem:[#allocation2 + $0xa0] sm:$0xff] }
 0x1da   :  { %1483 = vrot.lane.b32.xlu0 %v2562_v50, %s1802_s24 }
 0x1db   :  { %v870_v46 = vpop.permute.xlu1 %869 }
 0x1dc   :  { %894 = vst.msk [vmem:[#allocation2] sm:$0xfc] %vm893_vm9, %v870_v46  ;;  %v1146_v46 = vld [vmem:[#allocation2 + $0xb8] sm:$0xff] }
 0x1df   :  { %v919_v27 = vpop.permute.xlu1 %918 }
 0x1e0   :  { %942 = vst.msk [vmem:[#allocation2] sm:$0xfe] %vm254_vm2, %v919_v27  ;;  %v977_v33 = vpop.permute.xlu0 %976 }
 0x1e1   :  { %1000 = vst.msk [vmem:[#allocation2 + $0x8] sm:$0xff] %vm121_vm1, %v977_v33 }
 0x1e3   :  { %v822_v14 = vpop.permute.xlu1 %821 }
 0x1e4   :  { %845 = vst.msk [vmem:[#allocation2 + $0x18] sm:$0xff] %vm121_vm1, %v822_v14  ;;  %v1028_v43 = vpop.permute.xlu0 %1027 }
 0x1e5   :  { %1051 = vst.msk [vmem:[#allocation2 + $0x8] sm:$0xff] %vm189_vm13, %v1028_v43 }
 0x1e7   :  { %v872_v16 = vpop.permute.xlu1 %871  ;;  %v1123_v2 = vld [vmem:[#allocation2] sm:$0xff] }
 0x1e8   :  { %895 = vst.msk [vmem:[#allocation2 + $0x18] sm:$0xff] %vm189_vm13, %v872_v16  ;;  %v1079_v18 = vpop.permute.xlu0 %1078 }
 0x1e9   :  { %1102 = vst.msk [vmem:[#allocation2 + $0x8] sm:$0xff] %vm256_vm14, %v1079_v18 }
 0x1eb   :  { %v921_v50 = vpop.permute.xlu1 %920 }
 0x1ec   :  { %943 = vst.msk [vmem:[#allocation2 + $0x18] sm:$0xff] %vm256_vm14, %v921_v50  ;;  %v979_v20 = vpop.permute.xlu0 %978 }
 0x1ed   :  { %1001 = vst.msk [vmem:[#allocation2 + $0x20] sm:$0xff] %vm121_vm1, %v979_v20 }
 0x1ef   :  { %v824_v57 = vpop.permute.xlu1 %823 }
 0x1f0   :  { %846 = vst.msk [vmem:[#allocation2 + $0x30] sm:$0xff] %vm121_vm1, %v824_v57  ;;  %v1030_v3 = vpop.permute.xlu0 %1029  ;;  %v1124_v61 = vld [vmem:[#allocation2 + $0x8] sm:$0xff] }
 0x1f1   :  { %1052 = vst.msk [vmem:[#allocation2 + $0x20] sm:$0xff] %vm189_vm13, %v1030_v3  ;;  %1271 = vmatprep.mubr.f32.mxu1 %v1124_v61  ;;  %v2768_v3 = vld [vmem:[%s2829_s5] ss:$0 sm:$0xff] }
 0x1f2   :  { %1272 = vmatmul.mubr.f32.vlgmr.msra.gmra.mrb[8].mxu1 %v1123_v2  ;;  %v2773_v2 = vld [vmem:[%s2830_s6] ss:$0 sm:$0xff] }
 0x1f3   :  { %v874_v24 = vpop.permute.xlu1 %873  ;;  %1793 = vmatpush3.bf16.msra.mxu1 %v2262_v59  ;;  %v1126_v25 = vld [vmem:[#allocation2 + $0x18] sm:$0xff] }
 0x1f4   :  { %896 = vst.msk [vmem:[#allocation2 + $0x30] sm:$0xff] %vm189_vm13, %v874_v24  ;;  %v1081_v21 = vpop.permute.xlu0 %1080  ;;  %1792 = vmatprep.subr.bf16.mxu1 %v2276_v0 }
 0x1f5   :  { %1103 = vst.msk [vmem:[#allocation2 + $0x20] sm:$0xff] %vm256_vm14, %v1081_v21 }
 0x1f7   :  { %v923_v12 = vpop.permute.xlu1 %922  ;;  %1794 = vmatpush3.bf16.msra.mxu1 %v2276_v0 }
 0x1f8   :  { %944 = vst.msk [vmem:[#allocation2 + $0x30] sm:$0xff] %vm256_vm14, %v923_v12  ;;  %v983_v22 = vpop.permute.xlu0 %982 }
 0x1f9   :  { %1004 = vst.msk [vmem:[#allocation2 + $0x50] sm:$0x7f] %vm1003_vm12, %v983_v22 }
 0x1fa   :  { %1010 = vst.msk [vmem:[#allocation2 + $0x50] sm:$0xc0] %vm1009_vm3, %v1800_v4 }
 0x1fb   :  { %v826_v59 = vpop.permute.xlu1 %825 }
 0x1fc   :  { %847 = vst.msk [vmem:[#allocation2 + $0x48] sm:$0xff] %vm121_vm1, %v826_v59  ;;  %v1034_v29 = vpop.permute.xlu0 %1033  ;;  %v1127_v23 = vld [vmem:[#allocation2 + $0x20] sm:$0xff] }
 0x1fd   :  { %1055 = vst.msk [vmem:[#allocation2 + $0x50] sm:$0x3f] %vm1054_vm10, %v1034_v29  ;;  %1276 = vmatprep.mubr.f32.mxu1 %v1127_v23 }
 0x1fe   :  { %1061 = vst.msk [vmem:[#allocation2 + $0x50] sm:$0xe0] %vm1060_vm6, %v1800_v4  ;;  %1277 = vmatmul.mubr.f32.gmra.mrb[10].mxu1 %v1126_v25 }
 0x1ff   :  { %v876_v0 = vpop.permute.xlu1 %875  ;;  %v1129_v38 = vld [vmem:[#allocation2 + $0x30] sm:$0xff] }
 0x200   :  { %897 = vst.msk [vmem:[#allocation2 + $0x48] sm:$0xff] %vm189_vm13, %v876_v0  ;;  %v1085_v26 = vpop.permute.xlu0 %1084 }
 0x201   :  { %1106 = vst.msk [vmem:[#allocation2 + $0x50] sm:$0x1f] %vm1105_vm11, %v1085_v26 }
 0x203   :  { %v925_v28 = vpop.permute.xlu1 %924 }
 0x204   :  { %945 = vst.msk [vmem:[#allocation2 + $0x48] sm:$0xff] %vm256_vm14, %v925_v28  ;;  %v981_v45 = vpop.permute.xlu0 %980 }
 0x205   :  { %1002 = vst.msk [vmem:[#allocation2 + $0x38] sm:$0xff] %vm121_vm1, %v981_v45 }
 0x207   :  { %v828_v19 = vpop.permute.xlu1 %827 }
 0x208   :  { %848 = vst.msk [vmem:[#allocation2 + $0x60] sm:$0xf8] %vm843_vm4, %v828_v19  ;;  %v1032_v30 = vpop.permute.xlu0 %1031  ;;  %v1133_v1 = vld [vmem:[#allocation2 + $0x50] sm:$0xff] }
 0x209   :  { %1053 = vst.msk [vmem:[#allocation2 + $0x38] sm:$0xff] %vm189_vm13, %v1032_v30 }
 0x20b   :  { %v878_v31 = vpop.permute.xlu1 %877  ;;  %v1132_v41 = vld [vmem:[#allocation2 + $0x48] sm:$0xff] }
 0x20c   :  { %898 = vst.msk [vmem:[#allocation2 + $0x60] sm:$0xfc] %vm893_vm9, %v878_v31  ;;  %v1083_v7 = vpop.permute.xlu0 %1082 }
 0x20d   :  { %1104 = vst.msk [vmem:[#allocation2 + $0x38] sm:$0xff] %vm256_vm14, %v1083_v7 }
 0x20f   :  { %v927_v32 = vpop.permute.xlu1 %926 }
 0x210   :  { %946 = vst.msk [vmem:[#allocation2 + $0x60] sm:$0xfe] %vm254_vm2, %v927_v32  ;;  %v985_v13 = vpop.permute.xlu0 %984 }
 0x211   :  { %1005 = vst.msk [vmem:[#allocation2 + $0x68] sm:$0xff] %vm121_vm1, %v985_v13 }
 0x213   :  { %v830_v35 = vpop.permute.xlu1 %829 }
 0x214   :  { %849 = vst.msk [vmem:[#allocation2 + $0x78] sm:$0xff] %vm121_vm1, %v830_v35  ;;  %v1036_v36 = vpop.permute.xlu0 %1035  ;;  %v1130_v37 = vld [vmem:[#allocation2 + $0x38] sm:$0xff] }
 0x215   :  { %1056 = vst.msk [vmem:[#allocation2 + $0x68] sm:$0xff] %vm189_vm13, %v1036_v36  ;;  %1281 = vmatprep.mubr.f32.mxu1 %v1130_v37 }
 0x216   :  { %1282 = vmatmul.mubr.f32.gmra.mrb[12].mxu1 %v1129_v38 }
 0x217   :  { %v880_v39 = vpop.permute.xlu1 %879  ;;  %1286 = vmatprep.mubr.f32.mxu1 %v1133_v1  ;;  %v1135_v60 = vld [vmem:[#allocation2 + $0x60] sm:$0xff] }
 0x218   :  { %899 = vst.msk [vmem:[#allocation2 + $0x78] sm:$0xff] %vm189_vm13, %v880_v39  ;;  %v1087_v40 = vpop.permute.xlu0 %1086 }
 0x219   :  { %1107 = vst.msk [vmem:[#allocation2 + $0x68] sm:$0xff] %vm256_vm14, %v1087_v40 }
 0x21a   :  { %1287 = vmatmul.mubr.f32.gmra.mrb[14].mxu1 %v1132_v41 }
 0x21b   :  { %v929_v42 = vpop.permute.xlu1 %928 }
 0x21c   :  { %947 = vst.msk [vmem:[#allocation2 + $0x78] sm:$0xff] %vm256_vm14, %v929_v42  ;;  %v987_v8 = vpop.permute.xlu0 %986 }
 0x21d   :  { %1006 = vst.msk [vmem:[#allocation2 + $0x80] sm:$0xff] %vm121_vm1, %v987_v8 }
 0x21f   :  { %v832_v47 = vpop.permute.xlu1 %831 }
 0x220   :  { %850 = vst.msk [vmem:[#allocation2 + $0x90] sm:$0xff] %vm121_vm1, %v832_v47  ;;  %v1038_v48 = vpop.permute.xlu0 %1037  ;;  %v1136_v49 = vld [vmem:[#allocation2 + $0x68] sm:$0xff] }
 0x221   :  { %1057 = vst.msk [vmem:[#allocation2 + $0x80] sm:$0xff] %vm189_vm13, %v1038_v48  ;;  %1291 = vmatprep.mubr.f32.mxu1 %v1136_v49 }
 0x222   :  { %1292 = vmatmul.mubr.f32.gmra.mrb[16].mxu1 %v1135_v60 }
 0x223   :  { %v882_v51 = vpop.permute.xlu1 %881  ;;  %v1138_v5 = vld [vmem:[#allocation2 + $0x78] sm:$0xff] }
 0x224   :  { %900 = vst.msk [vmem:[#allocation2 + $0x90] sm:$0xff] %vm189_vm13, %v882_v51  ;;  %v1089_v52 = vpop.permute.xlu0 %1088 }
 0x225   :  { %1108 = vst.msk [vmem:[#allocation2 + $0x80] sm:$0xff] %vm256_vm14, %v1089_v52 }
 0x227   :  { %v931_v53 = vpop.permute.xlu1 %930 }
 0x228   :  { %948 = vst.msk [vmem:[#allocation2 + $0x90] sm:$0xff] %vm256_vm14, %v931_v53  ;;  %v991_v54 = vpop.permute.xlu0 %990 }
 0x229   :  { %1008 = vst.msk [vmem:[#allocation2 + $0xb0] sm:$0x7f] %vm1003_vm12, %v991_v54 }
 0x22a   :  { %1011 = vst.msk [vmem:[#allocation2 + $0xb0] sm:$0xc0] %vm1009_vm3, %v1800_v4 }
 0x22b   :  { %v834_v55 = vpop.permute.xlu1 %833 }
 0x22c   :  { %851 = vst.msk [vmem:[#allocation2 + $0xa8] sm:$0xff] %vm121_vm1, %v834_v55  ;;  %v1042_v34 = vpop.permute.xlu0 %1041  ;;  %v1139_v56 = vld [vmem:[#allocation2 + $0x80] sm:$0xff] }
 0x22d   :  { %1059 = vst.msk [vmem:[#allocation2 + $0xb0] sm:$0x3f] %vm1054_vm10, %v1042_v34  ;;  %1296 = vmatprep.mubr.f32.mxu1 %v1139_v56 }
 0x22e   :  { %1062 = vst.msk [vmem:[#allocation2 + $0xb0] sm:$0xe0] %vm1060_vm6, %v1800_v4  ;;  %1297 = vmatmul.mubr.f32.gmra.mrb[18].mxu1 %v1138_v5 }
 0x22f   :  { %v884_v11 = vpop.permute.xlu1 %883  ;;  %v1141_v10 = vld [vmem:[#allocation2 + $0x90] sm:$0xff] }
 0x230   :  { %901 = vst.msk [vmem:[#allocation2 + $0xa8] sm:$0xff] %vm189_vm13, %v884_v11  ;;  %v989_v58 = vpop.permute.xlu0 %988 }
 0x231   :  { %1007 = vst.msk [vmem:[#allocation2 + $0x98] sm:$0xff] %vm121_vm1, %v989_v58 }
 0x233   :  { %v933_v62 = vpop.permute.xlu1 %932 }
 0x234   :  { %949 = vst.msk [vmem:[#allocation2 + $0xa8] sm:$0xff] %vm256_vm14, %v933_v62  ;;  %v1040_v63 = vpop.permute.xlu0 %1039 }
 0x235   :  { %1058 = vst.msk [vmem:[#allocation2 + $0x98] sm:$0xff] %vm189_vm13, %v1040_v63 }
 0x237   :  { %v1474_v31 = vpop.permute.xlu1 %1473 }
 0x238   :  { %v1091_v6 = vpop.permute.xlu0 %1090 }
 0x239   :  { %1109 = vst.msk [vmem:[#allocation2 + $0x98] sm:$0xff] %vm256_vm14, %v1091_v6 }
 0x23b   :  { %v1144_v17 = vld [vmem:[#allocation2 + $0xa8] sm:$0xff]  ;;  %v1478_v56 = vpop.permute.xlu1 %1477 }
 0x23c   :  { %v1093_v9 = vpop.permute.xlu0 %1092 }
 0x23d   :  { %1110 = vst.msk [vmem:[#allocation2 + $0xb0] sm:$0x1f] %vm1105_vm11, %v1093_v9 }
 0x240   :  { %v1142_v4 = vld [vmem:[#allocation2 + $0x98] sm:$0xff]  ;;  %v1472_v29 = vpop.permute.xlu0 %1471 }
 0x241   :  { %1301 = vmatprep.mubr.f32.mxu1 %v1142_v4 }
 0x242   :  { %1302 = vmatmul.mubr.f32.gmra.mrb[20].mxu1 %v1141_v10 }
 0x244   :  { %v1145_v15 = vld [vmem:[#allocation2 + $0xb0] sm:$0xff]  ;;  %v1476_v60 = vpop.permute.xlu0 %1475 }
 0x245   :  { %1306 = vmatprep.mubr.f32.mxu1 %v1145_v15 }
 0x246   :  { %1307 = vmatmul.mubr.f32.gmra.mrb[22].mxu1 %v1144_v17 }
 0x247   :  { %1708 = vmatprep.mubr.msk.f32.mxu1 %vm70_vm0, %v1143_v44 }
 0x248   :  { %v1480_v9 = vpop.permute.xlu0 %1479 }
 0x24a   :  { %1709 = vmatmul.mubr.msk.f32.vlgmr.msra.gmra.mrb[24].mxu1 %vm70_vm0, %v1146_v46 }
 0x251   :  { %v1701_v27 = vpop.f32.mrb[16].mxu0 }
 0x252   :  { %v1378_v33 = vpop.f32.mrb[17].mxu0 }
 0x25a   :  { %v1704_v14 = vpop.f32.mrb[18].mxu0 }
 0x25b   :  { %v1388_v43 = vpop.f32.mrb[19].mxu0 }
 0x271   :  { %v2763_v16 = vpop.f32.mrb[20].mxu0 }
 0x272   :  { %v1398_v18 = vpop.f32.mrb[21].mxu0 }
 0x2c5   :  { %v1635_v50 = vpop.f32.mrb[8].mxu1 }
 0x2c6   :  { %v1636_v20 = vpop.f32.mrb[9].mxu1 }
 0x2c7   :  { %v1637_v57 = vadd.f32 %v1636_v20, %v1635_v50 }
 0x2c9   :  { %v1379_v61 = vadd.f32 %v1637_v57, %v1378_v33 }
 0x2cb   :  { %v1424_v24 = vmul.f32 %v2768_v3, %v1379_v61 }
 0x2cd   :  { %v1439_v21 = vadd.f32 %v2773_v2, %v1424_v24 }
 0x2cf   :  { %v1447_v12 = vmul.f32 0.01, %v1439_v21 }
 0x2d1   :  { %v1455_v22 = vmax.f32 %v1439_v21, %v1447_v12  ;;  %v1638_v59 = vpop.f32.mrb[10].mxu1 }
 0x2d2   :  { %v1639_v23 = vpop.f32.mrb[11].mxu1 }
 0x2d3   :  { %v1495_v25 = vadd.f32 %v1472_v29, %v1455_v22  ;;  %v1640_v0 = vadd.f32 %v1639_v23, %v1638_v59 }
 0x2d5   :  { %1503 = vst.msk [vmem:[%s2831_s7] sm:$0xff] %vm70_vm0, %v1495_v25  ;;  %v1384_v26 = vadd.f32 %v1701_v27, %v1640_v0 }
 0x2d7   :  { %v1425_v28 = vmul.f32 %v2768_v3, %v1384_v26 }
 0x2d9   :  { %v1440_v45 = vadd.f32 %v2773_v2, %v1425_v28 }
 0x2db   :  { %v1448_v19 = vmul.f32 0.01, %v1440_v45 }
 0x2dd   :  { %v1456_v30 = vmax.f32 %v1440_v45, %v1448_v19 }
 0x2df   :  { %v1496_v7 = vadd.f32 %v1474_v31, %v1456_v30  ;;  %v1484_v30 = vpop.permute.xlu0 %1483 }
 0x2e1   :  { %1504 = vst.msk [vmem:[%s2831_s7 + $0x8] sm:$0xff] %vm70_vm0, %v1496_v7 }
 0x2e9   :  { %v1641_v32 = vpop.f32.mrb[12].mxu1 }
 0x2ea   :  { %v1642_v13 = vpop.f32.mrb[13].mxu1 }
 0x2eb   :  { %v1643_v35 = vadd.f32 %v1642_v13, %v1641_v32 }
 0x2ed   :  { %v1389_v36 = vadd.f32 %v1643_v35, %v1388_v43  ;;  %v1644_v37 = vpop.f32.mrb[14].mxu1 }
 0x2ee   :  { %v1645_v38 = vpop.f32.mrb[15].mxu1 }
 0x2ef   :  { %v1426_v1 = vmul.f32 %v2768_v3, %v1389_v36  ;;  %v1646_v39 = vadd.f32 %v1645_v38, %v1644_v37 }
 0x2f1   :  { %v1441_v40 = vadd.f32 %v2773_v2, %v1426_v1  ;;  %v1394_v41 = vadd.f32 %v1704_v14, %v1646_v39  ;;  %v1482_v14 = vpop.permute.xlu1 %1481 }
 0x2f3   :  { %v1449_v42 = vmul.f32 0.01, %v1441_v40  ;;  %v1427_v8 = vmul.f32 %v2768_v3, %v1394_v41 }
 0x2f5   :  { %v1457_v47 = vmax.f32 %v1441_v40, %v1449_v42  ;;  %v1442_v48 = vadd.f32 %v2773_v2, %v1427_v8  ;;  %v1647_v49 = vpop.f32.mrb[16].mxu1  ;;  %v1486_v45 = vpop.permute.xlu1 %1485 }
 0x2f6   :  { %v1648_v51 = vpop.f32.mrb[17].mxu1 }
 0x2f7   :  { %v1497_v52 = vadd.f32 %v1476_v60, %v1457_v47  ;;  %v1450_v53 = vmul.f32 0.01, %v1442_v48  ;;  %v1649_v54 = vadd.f32 %v1648_v51, %v1647_v49 }
 0x2f9   :  { %1505 = vst.msk [vmem:[%s2831_s7 + $0x10] sm:$0xff] %vm70_vm0, %v1497_v52  ;;  %v1458_v55 = vmax.f32 %v1442_v48, %v1450_v53  ;;  %v1399_v34 = vadd.f32 %v1649_v54, %v1398_v18 }
 0x2fb   :  { %v1498_v5 = vadd.f32 %v1478_v56, %v1458_v55  ;;  %v1428_v11 = vmul.f32 %v2768_v3, %v1399_v34 }
 0x2fd   :  { %1506 = vst.msk [vmem:[%s2831_s7 + $0x18] sm:$0xff] %vm70_vm0, %v1498_v5  ;;  %v1443_v58 = vadd.f32 %v2773_v2, %v1428_v11 }
 0x2ff   :  { %v1451_v62 = vmul.f32 0.01, %v1443_v58 }
 0x301   :  { %v1459_v63 = vmax.f32 %v1443_v58, %v1451_v62  ;;  %v1650_v6 = vpop.f32.mrb[18].mxu1 }
 0x302   :  { %v1651_v4 = vpop.f32.mrb[19].mxu1 }
 0x303   :  { %v1499_v10 = vadd.f32 %v1480_v9, %v1459_v63  ;;  %v1652_v15 = vadd.f32 %v1651_v4, %v1650_v6 }
 0x305   :  { %1507 = vst.msk [vmem:[%s2831_s7 + $0x20] sm:$0xff] %vm70_vm0, %v1499_v10  ;;  %v1404_v17 = vadd.f32 %v2763_v16, %v1652_v15 }
 0x307   :  { %v1429_v44 = vmul.f32 %v2768_v3, %v1404_v17 }
 0x309   :  { %v1444_v46 = vadd.f32 %v2773_v2, %v1429_v44 }
 0x30b   :  { %v1452_v27 = vmul.f32 0.01, %v1444_v46 }
 0x30d   :  { %v1460_v33 = vmax.f32 %v1444_v46, %v1452_v27 }
 0x30f   :  { %v1500_v43 = vadd.f32 %v1482_v14, %v1460_v33 }
 0x311   :  { %1508 = vst.msk [vmem:[%s2831_s7 + $0x28] sm:$0xff] %vm70_vm0, %v1500_v43 }
 0x315   :  { %v1653_v18 = vpop.f32.mrb[20].mxu1 }
 0x316   :  { %v1654_v50 = vpop.f32.mrb[21].mxu1 }
 0x317   :  { %v1655_v20 = vadd.f32 %v1654_v50, %v1653_v18 }
 0x319   :  { %v1656_v57 = vpop.f32.mrb[22].mxu1 }
 0x31a   :  { %v1657_v61 = vpop.f32.mrb[23].mxu1 }
 0x31b   :  { %v1658_v24 = vadd.f32 %v1657_v61, %v1656_v57 }
 0x31d   :  { %v1710_v16 = vpop.f32.mrb[24].mxu1 }
 0x31e   :  { %v1414_v21 = vadd.f32 %v1710_v16, %v1658_v24  ;;  %v1408_v12 = vpop.f32.mrb[25].mxu1 }
 0x31f   :  { %v1409_v22 = vadd.f32 %v1655_v20, %v1408_v12 }
 0x320   :  { %v1431_v59 = vmul.f32 %v2768_v3, %v1414_v21 }
 0x321   :  { %v1430_v29 = vmul.f32 %v2768_v3, %v1409_v22 }
 0x322   :  { %v1446_v23 = vadd.f32 %v2773_v2, %v1431_v59 }
 0x323   :  { %v1445_v25 = vadd.f32 %v2773_v2, %v1430_v29 }
 0x324   :  { %v1454_v0 = vmul.f32 0.01, %v1446_v23 }
 0x325   :  { %v1453_v26 = vmul.f32 0.01, %v1445_v25 }
 0x326   :  { %v1462_v28 = vmax.f32 %v1446_v23, %v1454_v0 }
 0x327   :  { %v1461_v19 = vmax.f32 %v1445_v25, %v1453_v26 }
 0x328   :  { %v1502_v31 = vadd.f32 %v1486_v45, %v1462_v28 }
 0x329   :  { %v1501_v7 = vadd.f32 %v1484_v30, %v1461_v19 }
 0x32a   :  { %1510 = vst.msk [vmem:[%s2831_s7 + $0x38] sm:$0xff] %vm70_vm0, %v1502_v31 }
 0x32b   :  { %1509 = vst.msk [vmem:[%s2831_s7 + $0x30] sm:$0xff] %vm70_vm0, %v1501_v7 }

</bundles_post_ra>
